<compile_context>
chip_gen: v7x
topology: tpu7x:2x2x1
jax: 0.10.0
libtpu: 0.0.40
codegen_flags: <defaults>
</compile_context>

<pallas_src>
import functools

import jax
import jax.numpy as jnp
from jax.experimental import pallas as pl
from jax.experimental.pallas import tpu as pltpu


# Per-model input quantizers (Q in the PyTorch module): None = FP (identity),
# otherwise uniform round-to-grid with the given scale.
QUANT_SCALES = (None, 8.0, 4.0)   # 'FP', 'Q1', 'Q2'

LANE = 128          # lane width (last dim)
SUBLANE_BF16 = 16   # bf16-native sublane tile (second-to-last dim)
MAX_B_TILE = 512    # fills v6e/v7x 256-wide MXU; fits comfortably in VMEM
NEG_BIG = -1e30


def _round_up(v, m):
    return (v + m - 1) // m * m


def _ensemble_kernel(x_ref, w_ref, b_ref, choose_ref, out_ref,
                     *, quant_scales, nc_pad):
    """x_ref: [Bt, D] bf16; w_ref: [M, D, NCp] bf16; b_ref: [M, NCp] f32;
    choose_ref: [Bt, 1] i32 (random model index per row); out_ref: [Bt, NCp] bf16."""
    Bt = x_ref.shape[0]
    M = len(quant_scales)

    # Elementwise work stays f32 (no bf16 VPU on v5e); bf16 only at MXU operands.
    x = x_ref[...].astype(jnp.float32)                               # [Bt, D]
    bias = b_ref[...]                                                # [M, NCp] f32

    iota_bn = jax.lax.broadcasted_iota(jnp.int32, (Bt, nc_pad), 1)

    preds = []
    votes = jnp.zeros((Bt, nc_pad), jnp.float32)
    for m, s in enumerate(quant_scales):
        # Per-model input quantization (identity for the FP model).
        qx = x if s is None else jnp.round(x * s) * (1.0 / s)
        # One MXU matmul per model; f32 accumulation, f32 bias add.
        logits = jnp.dot(qx.astype(w_ref.dtype), w_ref[m],
                         preferred_element_type=jnp.float32)         # [Bt, NCp]
        logits = logits + bias[m:m + 1, :]       # padded classes sit at -1e30
        # argmax over classes (first maximal index, matching torch.argmax).
        mx = jnp.max(logits, axis=-1, keepdims=True)                 # [Bt, 1]
        cand = jnp.where(logits == mx, iota_bn, nc_pad)
        pred_m = jnp.min(cand, axis=-1, keepdims=True)               # [Bt, 1] i32
        preds.append(pred_m)
        # one-hot vote accumulation.
        votes = votes + (iota_bn == pred_m).astype(jnp.float32)      # [Bt, NCp]

    # Disagreement rows: every model predicted a different class -> max vote == 1.
    max_votes = jnp.max(votes, axis=-1, keepdims=True)               # [Bt, 1]
    disagree = (max_votes == 1.0)

    # Randomly chosen model's prediction per row (choose precomputed outside;
    # only consumed at disagreement rows).
    choose = choose_ref[...]                                         # [Bt, 1] i32
    chosen = preds[0]                                                # [Bt, 1]
    for m in range(1, M):
        chosen = jnp.where(choose == m, preds[m], chosen)
    chosen_onehot = (iota_bn == chosen).astype(jnp.float32)          # [Bt, NCp]

    out_ref[...] = jnp.where(disagree, chosen_onehot, votes).astype(out_ref.dtype)


def prepare_params(weights, biases, num_classes):
    """One-time layout plumbing (hoisted out of the per-call forward path):
    lane-pad the class dim to 128 and cast weights to bf16."""
    M, D, NC = weights.shape
    assert NC == num_classes
    nc_pad = _round_up(max(num_classes, LANE), LANE)

    # bf16 weights, zero in padded class columns.
    w_pad = jnp.zeros((M, D, nc_pad), jnp.bfloat16)
    w_pad = w_pad.at[:, :, :NC].set(weights.astype(jnp.bfloat16))

    # f32 bias; padded classes pushed to -1e30 so argmax never selects them.
    b_pad = jnp.full((M, nc_pad), NEG_BIG, jnp.float32)
    b_pad = b_pad.at[:, :NC].set(biases.reshape(M, NC).astype(jnp.float32))
    return w_pad, b_pad


def ensemble_forward(x_nchw, w_pad, b_pad, choose, num_classes,
                     quant_scales=QUANT_SCALES):
    """x_nchw: [B, C, H, W]; w_pad: [M, D, NCp] bf16; b_pad: [M, NCp] f32;
    choose: [B] int32 random model index (consumed only at disagreement rows)."""
    B = x_nchw.shape[0]
    M, D, nc_pad = w_pad.shape
    assert M == len(quant_scales)

    # Batch tiling: large tiles amortise grid-step overhead and fill the MXU;
    # 16-row granularity keeps bf16 blocks on native sublane tiles.
    b_tile = MAX_B_TILE if B >= MAX_B_TILE else _round_up(B, SUBLANE_BF16)
    b_padded = _round_up(B, b_tile)
    grid = (b_padded // b_tile,)

    # x streamed as bf16 (the matmul consumes bf16 anyway); pad batch only if needed.
    x2d = x_nchw.reshape(B, -1).astype(jnp.bfloat16)                 # torch .view(B, -1)
    if b_padded != B:
        x2d = jnp.pad(x2d, ((0, b_padded - B), (0, 0)))

    # Per-row random model choice as a narrow i32 column (not lane-broadcast).
    choose_col = jnp.zeros((b_padded, 1), jnp.int32)
    choose_col = choose_col.at[:B, 0].set(choose.astype(jnp.int32))

    kernel = functools.partial(_ensemble_kernel,
                               quant_scales=quant_scales, nc_pad=nc_pad)

    out_pad = pl.pallas_call(
        kernel,
        out_shape=jax.ShapeDtypeStruct((b_padded, nc_pad), jnp.bfloat16),
        grid=grid,
        in_specs=[
            pl.BlockSpec((b_tile, D), lambda i: (i, 0)),             # x tile (bf16)
            pl.BlockSpec((M, D, nc_pad), lambda i: (0, 0, 0)),       # weights (VMEM-resident)
            pl.BlockSpec((M, nc_pad), lambda i: (0, 0)),             # bias (VMEM-resident)
            pl.BlockSpec((b_tile, 1), lambda i: (i, 0)),             # choose column
        ],
        out_specs=pl.BlockSpec((b_tile, nc_pad), lambda i: (i, 0)),
        compiler_params=pltpu.CompilerParams(
            dimension_semantics=("parallel",),   # shards B tiles across TCs on v7x
            vmem_limit_bytes=32 << 20),
    )(x2d, w_pad, b_pad, choose_col)

    return out_pad[:B, :num_classes].astype(jnp.float32)


if __name__ == "__main__":
    # Small shapes consistent with the module (cifar-like, 10 classes).
    B, C, H, W = 2, 4, 16, 16
    NUM_CLASSES = 10
    NUM_MODELS = len(QUANT_SCALES)
    D = C * H * W

    key = jax.random.PRNGKey(0)
    kx, kw, kb, kc = jax.random.split(key, 4)

    x = jax.random.normal(kx, (B, C, H, W), jnp.float32)

    # Deterministic synthetic per-model parameters.
    weights = jax.random.normal(kw, (NUM_MODELS, D, NUM_CLASSES), jnp.float32) * 0.05
    biases = jax.random.normal(kb, (NUM_MODELS, NUM_CLASSES), jnp.float32) * 0.1

    # Random model choice per batch row (only consumed at disagreement rows),
    # mirroring torch.LongTensor(...).random_(0, num_models).
    choose = jax.random.randint(kc, (B,), 0, NUM_MODELS, dtype=jnp.int32)

    # One-time parameter layout prep (padding + bf16 cast hoisted out of forward).
    w_pad, b_pad = prepare_params(weights, biases, NUM_CLASSES)

    out = ensemble_forward(x, w_pad, b_pad, choose, NUM_CLASSES)
    out = jax.block_until_ready(out)

    # Sanity: each row is either the raw vote histogram (sums to NUM_MODELS)
    # or a single one-hot vote for a disagreement row (sums to 1).
    row_sums = jnp.sum(out, axis=1)
    assert out.shape == (B, NUM_CLASSES)
    assert bool(jnp.all((row_sums == NUM_MODELS) | (row_sums == 1.0)))
    assert bool(jnp.all((out >= 0.0) & (out <= NUM_MODELS)))

    print("KERNEL_OK")
</pallas_src>

<mosaic_0001>
module attributes {stable_mosaic.version = 11 : i64} {
  func.func @_ensemble_kernel(%arg0: i32, %arg1: memref<16x1024xbf16, #tpu.memory_space<vmem>>, %arg2: memref<3x1024x128xbf16, #tpu.memory_space<vmem>>, %arg3: memref<3x128xf32, #tpu.memory_space<vmem>>, %arg4: memref<16x1xi32, #tpu.memory_space<vmem>>, %arg5: memref<16x128xbf16, #tpu.memory_space<vmem>>) attributes {dimension_semantics = [#tpu.dimension_semantics<parallel>], iteration_bounds = array<i64: 1>, scalar_prefetch = 0 : i64, scratch_operands = 0 : i64, tpu.core_type = #tpu.core_type<tc>, window_params = [{transform_indices = @transform_0, window_bounds = array<i64: 16, 1024>}, {pipeline_mode = #tpu.pipeline_mode<synchronous>, transform_indices = @transform_1, window_bounds = array<i64: 3, 1024, 128>}, {pipeline_mode = #tpu.pipeline_mode<synchronous>, transform_indices = @transform_2, window_bounds = array<i64: 3, 128>}, {transform_indices = @transform_3, window_bounds = array<i64: 16, 1>}, {transform_indices = @transform_4, window_bounds = array<i64: 16, 128>}]} {
    %c0 = arith.constant 0 : index
    %c0_0 = arith.constant 0 : index
    %0 = vector.load %arg1[%c0, %c0_0] : memref<16x1024xbf16, #tpu.memory_space<vmem>>, vector<16x1024xbf16>
    %1 = arith.extf %0 : vector<16x1024xbf16> to vector<16x1024xf32>
    %c0_1 = arith.constant 0 : index
    %c0_2 = arith.constant 0 : index
    %2 = vector.load %arg3[%c0_1, %c0_2] : memref<3x128xf32, #tpu.memory_space<vmem>>, vector<3x128xf32>
    %3 = tpu.iota {dimensions = array<i32: 1>} : vector<16x128xi32>
    %cst = arith.constant 0.000000e+00 : f32
    %4 = vector.broadcast %cst : f32 to vector<16x128xf32>
    %5 = arith.truncf %1 : vector<16x1024xf32> to vector<16x1024xbf16>
    %c0_3 = arith.constant 0 : index
    %c0_4 = arith.constant 0 : index
    %c0_5 = arith.constant 0 : index
    %6 = vector.load %arg2[%c0_3, %c0_4, %c0_5] : memref<3x1024x128xbf16, #tpu.memory_space<vmem>>, vector<1x1024x128xbf16>
    %7 = vector.shape_cast %6 : vector<1x1024x128xbf16> to vector<1024x128xbf16>
    %cst_6 = arith.constant dense<0.000000e+00> : vector<16x128xf32>
    %8 = tpu.matmul %5, %7, %cst_6 {dimension_numbers = #tpu.dot_dimension_numbers<[1], [0], [0], [1], [0, 0, 1, 1], [], []>} : vector<16x1024xbf16>, vector<1024x128xbf16>, vector<16x128xf32> -> vector<16x128xf32>
    %9 = vector.extract_strided_slice %2 {offsets = [0, 0], sizes = [1, 128], strides = [1, 1]} : vector<3x128xf32> to vector<1x128xf32>
    %10 = vector.broadcast %9 : vector<1x128xf32> to vector<16x128xf32>
    %11 = arith.addf %8, %10 : vector<16x128xf32>
    %cst_7 = arith.constant dense<0xFF800000> : vector<16xf32>
    %12 = vector.multi_reduction <maximumf>, %11, %cst_7 [1] : vector<16x128xf32> to vector<16xf32>
    %13 = vector.shape_cast %12 : vector<16xf32> to vector<16x1xf32>
    %14 = vector.broadcast %13 : vector<16x1xf32> to vector<16x128xf32>
    %15 = arith.cmpf oeq, %11, %14 : vector<16x128xf32>
    %c128_i32 = arith.constant 128 : i32
    %16 = vector.broadcast %c128_i32 : i32 to vector<16x128xi32>
    %17 = arith.select %15, %3, %16 : vector<16x128xi1>, vector<16x128xi32>
    %cst_8 = arith.constant dense<2147483647> : vector<16xi32>
    %18 = vector.multi_reduction <minsi>, %17, %cst_8 [1] : vector<16x128xi32> to vector<16xi32>
    %19 = vector.shape_cast %18 : vector<16xi32> to vector<16x1xi32>
    %20 = vector.broadcast %19 : vector<16x1xi32> to vector<16x128xi32>
    %21 = arith.cmpi eq, %3, %20 : vector<16x128xi32>
    %22 = arith.extui %21 : vector<16x128xi1> to vector<16x128xi32>
    %23 = arith.sitofp %22 : vector<16x128xi32> to vector<16x128xf32>
    %24 = arith.addf %4, %23 : vector<16x128xf32>
    %cst_9 = arith.constant 8.000000e+00 : f32
    %25 = vector.broadcast %cst_9 : f32 to vector<16x1024xf32>
    %26 = arith.mulf %1, %25 : vector<16x1024xf32>
    %27 = math.roundeven %26 : vector<16x1024xf32>
    %cst_10 = arith.constant 1.250000e-01 : f32
    %28 = vector.broadcast %cst_10 : f32 to vector<16x1024xf32>
    %29 = arith.mulf %27, %28 : vector<16x1024xf32>
    %30 = arith.truncf %29 : vector<16x1024xf32> to vector<16x1024xbf16>
    %c1 = arith.constant 1 : index
    %c0_11 = arith.constant 0 : index
    %c0_12 = arith.constant 0 : index
    %31 = vector.load %arg2[%c1, %c0_11, %c0_12] : memref<3x1024x128xbf16, #tpu.memory_space<vmem>>, vector<1x1024x128xbf16>
    %32 = vector.shape_cast %31 : vector<1x1024x128xbf16> to vector<1024x128xbf16>
    %cst_13 = arith.constant dense<0.000000e+00> : vector<16x128xf32>
    %33 = tpu.matmul %30, %32, %cst_13 {dimension_numbers = #tpu.dot_dimension_numbers<[1], [0], [0], [1], [0, 0, 1, 1], [], []>} : vector<16x1024xbf16>, vector<1024x128xbf16>, vector<16x128xf32> -> vector<16x128xf32>
    %34 = vector.extract_strided_slice %2 {offsets = [1, 0], sizes = [1, 128], strides = [1, 1]} : vector<3x128xf32> to vector<1x128xf32>
    %35 = vector.broadcast %34 : vector<1x128xf32> to vector<16x128xf32>
    %36 = arith.addf %33, %35 : vector<16x128xf32>
    %cst_14 = arith.constant dense<0xFF800000> : vector<16xf32>
    %37 = vector.multi_reduction <maximumf>, %36, %cst_14 [1] : vector<16x128xf32> to vector<16xf32>
    %38 = vector.shape_cast %37 : vector<16xf32> to vector<16x1xf32>
    %39 = vector.broadcast %38 : vector<16x1xf32> to vector<16x128xf32>
    %40 = arith.cmpf oeq, %36, %39 : vector<16x128xf32>
    %c128_i32_15 = arith.constant 128 : i32
    %41 = vector.broadcast %c128_i32_15 : i32 to vector<16x128xi32>
    %42 = arith.select %40, %3, %41 : vector<16x128xi1>, vector<16x128xi32>
    %cst_16 = arith.constant dense<2147483647> : vector<16xi32>
    %43 = vector.multi_reduction <minsi>, %42, %cst_16 [1] : vector<16x128xi32> to vector<16xi32>
    %44 = vector.shape_cast %43 : vector<16xi32> to vector<16x1xi32>
    %45 = vector.broadcast %44 : vector<16x1xi32> to vector<16x128xi32>
    %46 = arith.cmpi eq, %3, %45 : vector<16x128xi32>
    %47 = arith.extui %46 : vector<16x128xi1> to vector<16x128xi32>
    %48 = arith.sitofp %47 : vector<16x128xi32> to vector<16x128xf32>
    %49 = arith.addf %24, %48 : vector<16x128xf32>
    %cst_17 = arith.constant 4.000000e+00 : f32
    %50 = vector.broadcast %cst_17 : f32 to vector<16x1024xf32>
    %51 = arith.mulf %1, %50 : vector<16x1024xf32>
    %52 = math.roundeven %51 : vector<16x1024xf32>
    %cst_18 = arith.constant 2.500000e-01 : f32
    %53 = vector.broadcast %cst_18 : f32 to vector<16x1024xf32>
    %54 = arith.mulf %52, %53 : vector<16x1024xf32>
    %55 = arith.truncf %54 : vector<16x1024xf32> to vector<16x1024xbf16>
    %c2 = arith.constant 2 : index
    %c0_19 = arith.constant 0 : index
    %c0_20 = arith.constant 0 : index
    %56 = vector.load %arg2[%c2, %c0_19, %c0_20] : memref<3x1024x128xbf16, #tpu.memory_space<vmem>>, vector<1x1024x128xbf16>
    %57 = vector.shape_cast %56 : vector<1x1024x128xbf16> to vector<1024x128xbf16>
    %cst_21 = arith.constant dense<0.000000e+00> : vector<16x128xf32>
    %58 = tpu.matmul %55, %57, %cst_21 {dimension_numbers = #tpu.dot_dimension_numbers<[1], [0], [0], [1], [0, 0, 1, 1], [], []>} : vector<16x1024xbf16>, vector<1024x128xbf16>, vector<16x128xf32> -> vector<16x128xf32>
    %59 = vector.extract_strided_slice %2 {offsets = [2, 0], sizes = [1, 128], strides = [1, 1]} : vector<3x128xf32> to vector<1x128xf32>
    %60 = vector.broadcast %59 : vector<1x128xf32> to vector<16x128xf32>
    %61 = arith.addf %58, %60 : vector<16x128xf32>
    %cst_22 = arith.constant dense<0xFF800000> : vector<16xf32>
    %62 = vector.multi_reduction <maximumf>, %61, %cst_22 [1] : vector<16x128xf32> to vector<16xf32>
    %63 = vector.shape_cast %62 : vector<16xf32> to vector<16x1xf32>
    %64 = vector.broadcast %63 : vector<16x1xf32> to vector<16x128xf32>
    %65 = arith.cmpf oeq, %61, %64 : vector<16x128xf32>
    %c128_i32_23 = arith.constant 128 : i32
    %66 = vector.broadcast %c128_i32_23 : i32 to vector<16x128xi32>
    %67 = arith.select %65, %3, %66 : vector<16x128xi1>, vector<16x128xi32>
    %cst_24 = arith.constant dense<2147483647> : vector<16xi32>
    %68 = vector.multi_reduction <minsi>, %67, %cst_24 [1] : vector<16x128xi32> to vector<16xi32>
    %69 = vector.shape_cast %68 : vector<16xi32> to vector<16x1xi32>
    %70 = vector.broadcast %69 : vector<16x1xi32> to vector<16x128xi32>
    %71 = arith.cmpi eq, %3, %70 : vector<16x128xi32>
    %72 = arith.extui %71 : vector<16x128xi1> to vector<16x128xi32>
    %73 = arith.sitofp %72 : vector<16x128xi32> to vector<16x128xf32>
    %74 = arith.addf %49, %73 : vector<16x128xf32>
    %cst_25 = arith.constant dense<0xFF800000> : vector<16xf32>
    %75 = vector.multi_reduction <maximumf>, %74, %cst_25 [1] : vector<16x128xf32> to vector<16xf32>
    %76 = vector.shape_cast %75 : vector<16xf32> to vector<16x1xf32>
    %cst_26 = arith.constant 1.000000e+00 : f32
    %77 = vector.broadcast %cst_26 : f32 to vector<16x1xf32>
    %78 = arith.cmpf oeq, %76, %77 : vector<16x1xf32>
    %c0_27 = arith.constant 0 : index
    %c0_28 = arith.constant 0 : index
    %79 = vector.load %arg4[%c0_27, %c0_28] : memref<16x1xi32, #tpu.memory_space<vmem>>, vector<16x1xi32>
    %c1_i32 = arith.constant 1 : i32
    %80 = vector.broadcast %c1_i32 : i32 to vector<16x1xi32>
    %81 = arith.cmpi eq, %79, %80 : vector<16x1xi32>
    %82 = arith.select %81, %44, %19 : vector<16x1xi1>, vector<16x1xi32>
    %c2_i32 = arith.constant 2 : i32
    %83 = vector.broadcast %c2_i32 : i32 to vector<16x1xi32>
    %84 = arith.cmpi eq, %79, %83 : vector<16x1xi32>
    %85 = arith.select %84, %69, %82 : vector<16x1xi1>, vector<16x1xi32>
    %86 = vector.broadcast %85 : vector<16x1xi32> to vector<16x128xi32>
    %87 = arith.cmpi eq, %3, %86 : vector<16x128xi32>
    %88 = arith.extui %87 : vector<16x128xi1> to vector<16x128xi32>
    %89 = arith.sitofp %88 : vector<16x128xi32> to vector<16x128xf32>
    %90 = vector.shape_cast %78 : vector<16x1xi1> to vector<16x1xi1>
    %91 = vector.broadcast %90 : vector<16x1xi1> to vector<16x128xi1>
    %92 = arith.select %91, %89, %74 : vector<16x128xi1>, vector<16x128xf32>
    %93 = arith.truncf %92 : vector<16x128xf32> to vector<16x128xbf16>
    %c0_29 = arith.constant 0 : index
    %c0_30 = arith.constant 0 : index
    %94 = vector.load %arg5[%c0_29, %c0_30] : memref<16x128xbf16, #tpu.memory_space<vmem>>, vector<16x128xbf16>
    tpu.vector_store %arg5[%c0_29, %c0_30], %93 {strides = array<i32>} : memref<16x128xbf16, #tpu.memory_space<vmem>>, vector<16x128xbf16>,
    return
  }
  func.func @transform_0(%arg0: i32) -> (i32, i32) {
    %c0_i32 = arith.constant 0 : i32
    %c0_i32_0 = arith.constant 0 : i32
    return %arg0, %c0_i32 : i32, i32
  }
  func.func @transform_1(%arg0: i32) -> (i32, i32, i32) {
    %c0_i32 = arith.constant 0 : i32
    %c0_i32_0 = arith.constant 0 : i32
    %c0_i32_1 = arith.constant 0 : i32
    %c0_i32_2 = arith.constant 0 : i32
    return %c0_i32, %c0_i32_0, %c0_i32_1 : i32, i32, i32
  }
  func.func @transform_2(%arg0: i32) -> (i32, i32) {
    %c0_i32 = arith.constant 0 : i32
    %c0_i32_0 = arith.constant 0 : i32
    %c0_i32_1 = arith.constant 0 : i32
    return %c0_i32, %c0_i32_0 : i32, i32
  }
  func.func @transform_3(%arg0: i32) -> (i32, i32) {
    %c0_i32 = arith.constant 0 : i32
    %c0_i32_0 = arith.constant 0 : i32
    return %arg0, %c0_i32 : i32, i32
  }
  func.func @transform_4(%arg0: i32) -> (i32, i32) {
    %c0_i32 = arith.constant 0 : i32
    %c0_i32_0 = arith.constant 0 : i32
    return %arg0, %c0_i32 : i32, i32
  }
}

</mosaic_0001>

<bundles_post_ra>
// kernel: tpu_custom_call.1
= control target key start
LH: loop header
LB: loop body
LE: loop exit
PB: predicated region body
PF: predicated region fallthrough
CT: control target
= control target key end

     0   :  { %9 = vsyncpa [#allocation3], 0  ;;  %s3568_s0 = inlined_call_operand.hbm [shape: bf16[16,1024], index: 0, kind: input, shape index: {}]   ;;  %s3569_s1 = inlined_call_operand.hbm [shape: bf16[3,1024,128], index: 1, kind: input, shape index: {}]   ;;  %s3570_s2 = inlined_call_operand.vmem [shape: f32[3,128], index: 2, kind: input, shape index: {}]   ;;  %s3571_s3 = inlined_call_operand.vmem [shape: s32[16,1], index: 3, kind: input, shape index: {}]   ;;  %s3572_s4 = inlined_call_operand.hbm [shape: bf16[16,128], index: 4, kind: output, shape index: {}]  }
   0x1   :  { %10 = vsyncpa [#allocation6], 0 }
   0x2   :  { %11 = vsyncpa [#allocation4], 0  ;;  %s3250_s15 = smov [#allocation2]   ;;  %s3178_s19 = scalar_lea.hbm %s3568_s0, 1024 }
   0x3   :  { %s17_s16 = sshll.u32 %s3250_s15, 4  ;;  %p3179_p0 = scmp.ne.s32.totalorder %s3568_s0, %s3178_s19  ;;  %s18_s16 = int_to_ptr.vmem [resolvable:$true] %s17_s16 }
   0x4   :  { %p3182_p1 = scmp.lt.u32.totalorder %s3178_s19, %s3568_s0 }
   0x6   :  { %p3184_p2 = pnand %p3182_p1, %p3179_p0 }
   0x8   :  { %3187 = shalt.err (!%p3184_p2)
}
   0x9   :  { %s3188_s24 = scalar_lea.vmem %s18_s16, 1024  ;;  %p3193_p4 = scmp.lt.s32.totalorder %s18_s16, %s18_s16 }
   0xa   :  { %p3189_p3 = scmp.ne.s32.totalorder %s18_s16, %s3188_s24  ;;  %p3194_p5 = scmp.lt.s32.totalorder %s3188_s24, %s3188_s24 }
   0xc   :  { %p3195_p6 = por %p3194_p5, %p3193_p4 }
   0xe   :  { %p3196_p7 = pnand %p3195_p6, %p3189_p3 }
  0x10   :  { %3199 = shalt.err (!%p3196_p7)
}
  0x11   :  { %s3251_s25 = smov 512   ;;  %s3252_s26 = smov 32  }
  0x12   :  { %23 = dma.hbm_to_vmem [thread:$0]  %s3568_s0, 1024, %s18_s16, [#allocation3], %s3251_s25, %s3251_s25, %s3252_s26  }
  0x13   :  { %s3253_s29 = smov [#allocation5]   ;;  %s3200_s7 = scalar_lea.hbm %s3569_s1, 24576 }
  0x14   :  { %s29_s30 = sshll.u32 %s3253_s29, 4  ;;  %p3201_p8 = scmp.ne.s32.totalorder %s3569_s1, %s3200_s7  ;;  %s30_s30 = int_to_ptr.vmem [resolvable:$true] %s29_s30 }
  0x15   :  { %p3204_p9 = scmp.lt.u32.totalorder %s3200_s7, %s3569_s1 }
  0x17   :  { %p3206_p10 = pnand %p3204_p9, %p3201_p8 }
  0x19   :  { %3209 = shalt.err (!%p3206_p10)
}
  0x1a   :  { %s3210_s12 = scalar_lea.vmem %s30_s30, 24576  ;;  %p3215_p12 = scmp.lt.s32.totalorder %s30_s30, %s30_s30 }
  0x1b   :  { %p3211_p11 = scmp.ne.s32.totalorder %s30_s30, %s3210_s12  ;;  %p3216_p13 = scmp.lt.s32.totalorder %s3210_s12, %s3210_s12 }
  0x1d   :  { %p3217_p0 = por %p3216_p13, %p3215_p12 }
  0x1f   :  { %p3218_p1 = pnand %p3217_p0, %p3211_p11 }
  0x21   :  { %3221 = shalt.err (!%p3218_p1)
}
  0x22   :  { %s3254_s0 = smov 64   ;;  %s3255_s13 = smov 4  }
  0x23   :  { %35 = dma.hbm_to_vmem [thread:$0]  %s3569_s1, 24576, %s30_s30, [#allocation6], %s3254_s0, %s3254_s0, %s3255_s13  }
  0x24   :  { %3244 = dma.done.wait [#allocation3], 1024  }
  0x25   :  { %3245 = vsyncadd [#allocation3], 4294966272 }
  0x26   :  { %3246 = dma.done.wait [#allocation6], 24576  }
  0x27   :  { %3247 = vsyncadd [#allocation6], 4294942720  ;;  %v2986_v0 = vld [vmem:[#allocation5 + $0x40] sm:$0xff]   ;;  %v2990_v4 = vld [vmem:[#allocation5 + $0x48] sm:$0xff]  }
  0x28   :  { %v2987_v1 = vld [vmem:[#allocation5 + $0xc0] sm:$0xff]   ;;  %2679 = vmatprep.subr.bf16.mxu0 %v2986_v0  ;;  %v2991_v5 = vld [vmem:[#allocation5 + $0xc8] sm:$0xff]   ;;  %v2994_v8 = vld [vmem:[#allocation5 + $0x50] sm:$0xff]  }
  0x29   :  { %v2988_v2 = vld [vmem:[#allocation5] sm:$0xff]   ;;  %2701 = vmatprep.subr.bf16.mxu1 %v2987_v1  ;;  %v2992_v6 = vld [vmem:[#allocation5 + $0x8] sm:$0xff]   ;;  %v2995_v9 = vld [vmem:[#allocation5 + $0xd0] sm:$0xff]  }
  0x2a   :  { %v2989_v3 = vld [vmem:[#allocation5 + $0x80] sm:$0xff]   ;;  %2680 = vmatpush3.bf16.msra.mxu0 %v2988_v2  ;;  %v2993_v7 = vld [vmem:[#allocation5 + $0x88] sm:$0xff]   ;;  %v2996_v10 = vld [vmem:[#allocation5 + $0x10] sm:$0xff]  }
  0x2b   :  { %2702 = vmatpush3.bf16.msra.mxu1 %v2989_v3  ;;  %2681 = vmatprep.subr.bf16.mxu0 %v2990_v4  ;;  %v2997_v11 = vld [vmem:[#allocation5 + $0x90] sm:$0xff]   ;;  %v2998_v12 = vld [vmem:[#allocation5 + $0x58] sm:$0xff]   ;;  %v3002_v16 = vld [vmem:[#allocation5 + $0x60] sm:$0xff]  }
  0x2c   :  { %2703 = vmatprep.subr.bf16.mxu1 %v2991_v5  ;;  %v2999_v13 = vld [vmem:[#allocation5 + $0xd8] sm:$0xff]   ;;  %v3003_v17 = vld [vmem:[#allocation5 + $0xe0] sm:$0xff]   ;;  %v3006_v20 = vld [vmem:[#allocation5 + $0x68] sm:$0xff]  }
  0x2d   :  { %v3000_v14 = vld [vmem:[#allocation5 + $0x18] sm:$0xff]   ;;  %v3004_v18 = vld [vmem:[#allocation5 + $0x20] sm:$0xff]   ;;  %v3007_v21 = vld [vmem:[#allocation5 + $0xe8] sm:$0xff]  }
  0x2e   :  { %2682 = vmatpush3.bf16.msra.mxu0 %v2992_v6  ;;  %v3001_v15 = vld [vmem:[#allocation5 + $0x98] sm:$0xff]   ;;  %v3005_v19 = vld [vmem:[#allocation5 + $0xa0] sm:$0xff]   ;;  %v3008_v22 = vld [vmem:[#allocation5 + $0x28] sm:$0xff]  }
  0x2f   :  { %2704 = vmatpush3.bf16.msra.mxu1 %v2993_v7  ;;  %2683 = vmatprep.subr.bf16.mxu0 %v2994_v8  ;;  %v3009_v23 = vld [vmem:[#allocation5 + $0xa8] sm:$0xff]   ;;  %v3010_v24 = vld [vmem:[#allocation5 + $0x70] sm:$0xff]   ;;  %v3014_v28 = vld [vmem:[#allocation5 + $0x78] sm:$0xff]  }
  0x30   :  { %2705 = vmatprep.subr.bf16.mxu1 %v2995_v9  ;;  %v3011_v25 = vld [vmem:[#allocation5 + $0xf0] sm:$0xff]   ;;  %v3015_v29 = vld [vmem:[#allocation5 + $0xf8] sm:$0xff]   ;;  %v3311_v32 = vld [vmem:[#allocation2] sm:$0xff] }
  0x31   :  { %v3012_v26 = vld [vmem:[#allocation5 + $0x30] sm:$0xff]   ;;  %v3016_v30 = vld [vmem:[#allocation5 + $0x38] sm:$0xff]   ;;  %v3313_v33 = vld [vmem:[#allocation2 + $0x20] sm:$0xff]  ;;  %v55_v45 = vunpack.c.l.bf16 %v3311_v32  ;;  %v56_v49 = vunpack.c.h.bf16 %v3311_v32 }
  0x32   :  { %2684 = vmatpush3.bf16.msra.mxu0 %v2996_v10  ;;  %v3013_v27 = vld [vmem:[#allocation5 + $0xb0] sm:$0xff]   ;;  %v3017_v31 = vld [vmem:[#allocation5 + $0xb8] sm:$0xff]   ;;  %v3315_v34 = vld [vmem:[#allocation2 + $0x8] sm:$0xff]  ;;  %v2463_v36 = vcombine.high %v3311_v32, %v3313_v33  ;;  %v2462_v41 = vcombine.low %v3311_v32, %v3313_v33  ;;  %v63_v47 = vunpack.c.l.bf16 %v3313_v33  ;;  %v64_v53 = vunpack.c.h.bf16 %v3313_v33 }
  0x33   :  { %2706 = vmatpush3.bf16.msra.mxu1 %v2997_v11  ;;  %2685 = vmatprep.subr.bf16.mxu0 %v2998_v12  ;;  %v3317_v35 = vld [vmem:[#allocation2 + $0x28] sm:$0xff]  ;;  %v3018_v37 = vld [vmem:[#allocation5 + $0x140] sm:$0xff]   ;;  %v3332_v50 = vmul.f32 4.0, %v55_v45  ;;  %v57_v51 = vunpack.c.l.bf16 %v3315_v34  ;;  %v3026_v56 = vld [vmem:[#allocation5 + $0x150] sm:$0xff]   ;;  %v58_v57 = vunpack.c.h.bf16 %v3315_v34  ;;  %v3349_v0 = vmul.f32 8.0, %v56_v49 }
  0x34   :  { %2707 = vmatprep.subr.bf16.mxu1 %v2999_v13  ;;  %v3019_v38 = vld [vmem:[#allocation5 + $0x1c0] sm:$0xff]   ;;  %662 = vmatprep.mubr.bf16.mxu0 %v2463_v36  ;;  %v2465_v39 = vcombine.high %v3315_v34, %v3317_v35  ;;  %v2464_v42 = vcombine.low %v3315_v34, %v3317_v35  ;;  %v3022_v44 = vld [vmem:[#allocation5 + $0x148] sm:$0xff]   ;;  %v1627_v54 = vmul.f32 4.0, %v63_v47  ;;  %v65_v55 = vunpack.c.l.bf16 %v3317_v35  ;;  %v3027_v59 = vld [vmem:[#allocation5 + $0x1d0] sm:$0xff]  }
  0x35   :  { %v3020_v40 = vld [vmem:[#allocation5 + $0x100] sm:$0xff]   ;;  %v3023_v46 = vld [vmem:[#allocation5 + $0x1c8] sm:$0xff]   ;;  %v3342_v58 = vmul.f32 4.0, %v57_v51  ;;  %v66_v60 = vunpack.c.h.bf16 %v3317_v35  ;;  %v3028_v62 = vld [vmem:[#allocation5 + $0x110] sm:$0xff]   ;;  %v3351_v2 = vmul.f32 8.0, %v64_v53  ;;  %v3353_v4 = vmul.f32 8.0, %v58_v57 }
  0x36   :  { %2686 = vmatpush3.bf16.msra.mxu0 %v3000_v14  ;;  %703 = vmatprep.mubr.bf16.mxu1 %v2465_v39  ;;  %v3021_v43 = vld [vmem:[#allocation5 + $0x180] sm:$0xff]   ;;  %v3024_v48 = vld [vmem:[#allocation5 + $0x108] sm:$0xff]   ;;  %v3347_v61 = vmul.f32 4.0, %v65_v55  ;;  %v3029_v63 = vld [vmem:[#allocation5 + $0x190] sm:$0xff]   ;;  %v1620_v8 = vmul.f32 4.0, %v56_v49  ;;  %v1628_v10 = vmul.f32 4.0, %v64_v53 }
  0x37   :  { %2708 = vmatpush3.bf16.msra.mxu1 %v3001_v15  ;;  %2687 = vmatprep.subr.bf16.mxu0 %v3002_v16  ;;  %v3025_v52 = vld [vmem:[#allocation5 + $0x188] sm:$0xff]   ;;  %v3030_v1 = vld [vmem:[#allocation5 + $0x158] sm:$0xff]   ;;  %v3355_v6 = vmul.f32 8.0, %v66_v60  ;;  %v3034_v9 = vld [vmem:[#allocation5 + $0x160] sm:$0xff]   ;;  %v1622_v13 = vmul.f32 4.0, %v58_v57  ;;  %v1630_v16 = vmul.f32 4.0, %v66_v60 }
  0x38   :  { %2709 = vmatprep.subr.bf16.mxu1 %v3003_v17  ;;  %v3031_v3 = vld [vmem:[#allocation5 + $0x1d8] sm:$0xff]   ;;  %v3035_v11 = vld [vmem:[#allocation5 + $0x1e0] sm:$0xff]   ;;  %v2960_v12 = vround.rtne.f32 %v1620_v8  ;;  %v2968_v15 = vround.rtne.f32 %v1628_v10  ;;  %v3041_v36 = vld [vmem:[#allocation5 + $0x1a8] sm:$0xff]   ;;  %v846_v32 = vmul.f32 8.0, %v63_v47 }
  0x39   :  { %v3032_v5 = vld [vmem:[#allocation5 + $0x118] sm:$0xff]   ;;  %v3036_v14 = vld [vmem:[#allocation5 + $0x120] sm:$0xff]   ;;  %v2954_v53 = vround.rtne.f32 %v3355_v6  ;;  %v838_v6 = vmul.f32 8.0, %v55_v45  ;;  %v3056_v47 = vld [vmem:[#allocation5 + $0x208] sm:$0xff]  }
  0x3a   :  { %2688 = vmatpush3.bf16.msra.mxu0 %v3004_v18  ;;  %v3033_v7 = vld [vmem:[#allocation5 + $0x198] sm:$0xff]   ;;  %v3037_v17 = vld [vmem:[#allocation5 + $0x1a0] sm:$0xff]   ;;  %v3357_v18 = vmul.f32 0.25, %v2960_v12  ;;  %v3057_v34 = vld [vmem:[#allocation5 + $0x288] sm:$0xff]  }
  0x3b   :  { %2710 = vmatpush3.bf16.msra.mxu1 %v3005_v19  ;;  %2689 = vmatprep.subr.bf16.mxu0 %v3006_v20  ;;  %v2962_v19 = vround.rtne.f32 %v1622_v13  ;;  %v2959_v20 = vround.rtne.f32 %v3332_v50  ;;  %v3045_v50 = vld [vmem:[#allocation5 + $0x1b0] sm:$0xff]   ;;  %v3047_v57 = vld [vmem:[#allocation5 + $0x1f8] sm:$0xff]   ;;  %v3051_v10 = vld [vmem:[#allocation5 + $0x2c0] sm:$0xff]  }
  0x3c   :  { %2711 = vmatprep.subr.bf16.mxu1 %v3007_v21  ;;  %v3038_v21 = vld [vmem:[#allocation5 + $0x168] sm:$0xff]   ;;  %v3052_v12 = vld [vmem:[#allocation5 + $0x200] sm:$0xff]  }
  0x3d   :  { %v3053_v45 = vld [vmem:[#allocation5 + $0x280] sm:$0xff]  }
  0x3e   :  { %2690 = vmatpush3.bf16.msra.mxu0 %v3008_v22  ;;  %v3360_v22 = vmul.f32 0.25, %v2968_v15 }
  0x3f   :  { %2712 = vmatpush3.bf16.msra.mxu1 %v3009_v23  ;;  %2691 = vmatprep.subr.bf16.mxu0 %v3010_v24  ;;  %v2970_v23 = vround.rtne.f32 %v1630_v16  ;;  %v2967_v24 = vround.rtne.f32 %v1627_v54  ;;  %v3046_v54 = vld [vmem:[#allocation5 + $0x178] sm:$0xff]   ;;  %v840_v16 = vmul.f32 8.0, %v57_v51  ;;  %v2951_v51 = vround.rtne.f32 %v846_v32 }
  0x40   :  { %2713 = vmatprep.subr.bf16.mxu1 %v3011_v25  ;;  %v3039_v25 = vld [vmem:[#allocation5 + $0x1e8] sm:$0xff]  }
  0x41   :  { %v2945_v35 = vround.rtne.f32 %v840_v16 }
  0x42   :  { %2692 = vmatpush3.bf16.msra.mxu0 %v3012_v26  ;;  %v3362_v26 = vmul.f32 0.25, %v2962_v19  ;;  %v2943_v19 = vround.rtne.f32 %v838_v6  ;;  %v3067_v6 = vld [vmem:[#allocation5 + $0x2e0] sm:$0xff]  }
  0x43   :  { %2714 = vmatpush3.bf16.msra.mxu1 %v3013_v27  ;;  %2693 = vmatprep.subr.bf16.mxu0 %v3014_v28  ;;  %v2961_v27 = vround.rtne.f32 %v3342_v58  ;;  %v3040_v28 = vld [vmem:[#allocation5 + $0x128] sm:$0xff]  }
  0x44   :  { %2715 = vmatprep.subr.bf16.mxu1 %v3015_v29  ;;  %v1668_v29 = vpack.c.bf16 %v3360_v22, %v3357_v18  ;;  %v3127_v18 = vld [vmem:[#allocation5 + $0x4d8] sm:$0xff]  }
  0x45   :  { %v3128_v22 = vld [vmem:[#allocation5 + $0x418] sm:$0xff]  }
  0x46   :  { %2694 = vmatpush3.bf16.msra.mxu0 %v3016_v30  ;;  %v3367_v30 = vmul.f32 0.25, %v2970_v23 }
  0x47   :  { %2716 = vmatpush3.bf16.msra.mxu1 %v3017_v31  ;;  %2723 = vmatprep.subr.bf16.mxu0 %v3018_v37  ;;  %v2969_v31 = vround.rtne.f32 %v3347_v61  ;;  %v3370_v37 = vmul.f32 0.25, %v2959_v20  ;;  %v3049_v61 = vld [vmem:[#allocation5 + $0x1b8] sm:$0xff]   ;;  %v848_v20 = vmul.f32 8.0, %v65_v55  ;;  %v3059_v55 = vld [vmem:[#allocation5 + $0x2d0] sm:$0xff]  }
  0x48   :  { %2745 = vmatprep.subr.bf16.mxu1 %v3019_v38  ;;  %v3042_v38 = vld [vmem:[#allocation5 + $0x170] sm:$0xff]   ;;  %v1670_v39 = vpack.c.bf16 %v3367_v30, %v3362_v26  ;;  %v3130_v26 = vld [vmem:[#allocation5 + $0x460] sm:$0xff]  }
  0x49   :  { %663 = vmatmul.mubr.bf16.vlgmr.msra.gmra.mrb[0].mxu0 %v2462_v41  ;;  %v3043_v41 = vld [vmem:[#allocation5 + $0x1f0] sm:$0xff]   ;;  %v3382_v49 = vmul.f32 0.25, %v2969_v31  ;;  %v2953_v31 = vround.rtne.f32 %v848_v20  ;;  %v3131_v30 = vld [vmem:[#allocation5 + $0x4e0] sm:$0xff]  }
  0x4a   :  { %704 = vmatmul.mubr.bf16.vlgmr.msra.gmra.mrb[0].mxu1 %v2464_v42  ;;  %2724 = vmatpush3.bf16.msra.mxu0 %v3020_v40  ;;  %v3374_v40 = vmul.f32 0.25, %v2967_v24  ;;  %v2944_v42 = vround.rtne.f32 %v3349_v0 }
  0x4b   :  { %2746 = vmatpush3.bf16.msra.mxu1 %v3021_v43  ;;  %2725 = vmatprep.subr.bf16.mxu0 %v3022_v44  ;;  %v3377_v43 = vmul.f32 0.25, %v2961_v27  ;;  %v3044_v44 = vld [vmem:[#allocation5 + $0x130] sm:$0xff]  }
  0x4c   :  { %2747 = vmatprep.subr.bf16.mxu1 %v3023_v46  ;;  %v2952_v46 = vround.rtne.f32 %v3351_v2  ;;  %v871_v58 = vmul.f32 0.125, %v2944_v42  ;;  %v3058_v27 = vld [vmem:[#allocation5 + $0x250] sm:$0xff]  }
  0x4e   :  { %2726 = vmatpush3.bf16.msra.mxu0 %v3024_v48  ;;  %v1667_v48 = vpack.c.bf16 %v3374_v40, %v3370_v37  ;;  %v879_v60 = vmul.f32 0.125, %v2952_v46  ;;  %v3418_v46 = vmul.f32 0.125, %v2951_v51  ;;  %v3153_v37 = vld [vmem:[#allocation5 + $0x588] sm:$0xff]   ;;  %v3154_v40 = vld [vmem:[#allocation5 + $0x550] sm:$0xff]  }
  0x4f   :  { %2748 = vmatpush3.bf16.msra.mxu1 %v3025_v52  ;;  %2727 = vmatprep.subr.bf16.mxu0 %v3026_v56  ;;  %v2946_v52 = vround.rtne.f32 %v3353_v4  ;;  %v1669_v56 = vpack.c.bf16 %v3382_v49, %v3377_v43  ;;  %v3396_v4 = vld [vmem:[#allocation2 + $0x38] sm:$0xff]  ;;  %v3155_v43 = vld [vmem:[#allocation5 + $0x5d0] sm:$0xff]  }
  0x50   :  { %2749 = vmatprep.subr.bf16.mxu1 %v3027_v59  ;;  %v3048_v59 = vld [vmem:[#allocation5 + $0x138] sm:$0xff]   ;;  %v70_v24 = vunpack.c.h.bf16 %v3396_v4  ;;  %v3157_v49 = vld [vmem:[#allocation5 + $0x590] sm:$0xff]  }
  0x51   :  { %v873_v0 = vmul.f32 0.125, %v2946_v52  ;;  %v3062_v52 = vld [vmem:[#allocation5 + $0x258] sm:$0xff]  }
  0x52   :  { %2728 = vmatpush3.bf16.msra.mxu0 %v3028_v62  ;;  %v3388_v62 = vld [vmem:[#allocation2 + $0x10] sm:$0xff]  ;;  %v853_v42 = vmul.f32 8.0, %v70_v24  ;;  %v1634_v20 = vmul.f32 4.0, %v70_v24 }
  0x53   :  { %2750 = vmatpush3.bf16.msra.mxu1 %v3029_v63  ;;  %2729 = vmatprep.subr.bf16.mxu0 %v3030_v1  ;;  %v3390_v63 = vld [vmem:[#allocation2 + $0x30] sm:$0xff]  ;;  %v881_v1 = vmul.f32 0.125, %v2954_v53  ;;  %v3420_v53 = vmul.f32 0.125, %v2945_v35 }
  0x54   :  { %2751 = vmatprep.subr.bf16.mxu1 %v3031_v3  ;;  %v2467_v2 = vcombine.high %v3388_v62, %v3390_v63  ;;  %v3394_v3 = vld [vmem:[#allocation2 + $0x18] sm:$0xff]  ;;  %v68_v15 = vunpack.c.h.bf16 %v3390_v63  ;;  %v3076_v24 = vld [vmem:[#allocation5 + $0x230] sm:$0xff]  }
  0x55   :  { %v2468_v8 = vcombine.low %v3394_v3, %v3396_v4  ;;  %v889_v13 = vpack.c.bf16 %v881_v1, %v873_v0  ;;  %v62_v33 = vunpack.c.h.bf16 %v3394_v3  ;;  %v3065_v0 = vld [vmem:[#allocation5 + $0x298] sm:$0xff]  }
  0x56   :  { %2730 = vmatpush3.bf16.msra.mxu0 %v3032_v5  ;;  %v2466_v5 = vcombine.low %v3388_v62, %v3390_v63  ;;  %744 = vmatprep.mubr.bf16.mxu0 %v2467_v2  ;;  %v3066_v2 = vld [vmem:[#allocation5 + $0x260] sm:$0xff]  }
  0x57   :  { %2752 = vmatpush3.bf16.msra.mxu1 %v3033_v7  ;;  %2731 = vmatprep.subr.bf16.mxu0 %v3034_v9  ;;  %v2469_v7 = vcombine.high %v3394_v3, %v3396_v4  ;;  %v3050_v9 = vld [vmem:[#allocation5 + $0x240] sm:$0xff]  }
  0x58   :  { %2753 = vmatprep.subr.bf16.mxu1 %v3035_v11  ;;  %v887_v11 = vpack.c.bf16 %v879_v60, %v871_v58 }
  0x59   :  { %785 = vmatprep.mubr.bf16.mxu1 %v2469_v7 }
  0x5a   :  { %2732 = vmatpush3.bf16.msra.mxu0 %v3036_v14  ;;  %v60_v14 = vunpack.c.h.bf16 %v3388_v62 }
  0x5b   :  { %2754 = vmatpush3.bf16.msra.mxu1 %v3037_v17  ;;  %2733 = vmatprep.subr.bf16.mxu0 %v3038_v21  ;;  %v3054_v17 = vld [vmem:[#allocation5 + $0x248] sm:$0xff]  }
  0x5c   :  { %2755 = vmatprep.subr.bf16.mxu1 %v3039_v25  ;;  %v3055_v21 = vld [vmem:[#allocation5 + $0x2c8] sm:$0xff]   ;;  %v843_v23 = vmul.f32 8.0, %v60_v14  ;;  %v851_v25 = vmul.f32 8.0, %v68_v15 }
  0x5e   :  { %2734 = vmatpush3.bf16.msra.mxu0 %v3040_v28  ;;  %v3416_v28 = vmul.f32 0.125, %v2943_v19  ;;  %v3072_v19 = vld [vmem:[#allocation5 + $0x228] sm:$0xff]  }
  0x5f   :  { %2756 = vmatpush3.bf16.msra.mxu1 %v3041_v36  ;;  %2735 = vmatprep.subr.bf16.mxu0 %v3042_v38  ;;  %v845_v36 = vmul.f32 8.0, %v62_v33  ;;  %v3060_v38 = vld [vmem:[#allocation5 + $0x210] sm:$0xff]  }
  0x60   :  { %2757 = vmatprep.subr.bf16.mxu1 %v3043_v41  ;;  %v2948_v41 = vround.rtne.f32 %v843_v23 }
  0x61   :  { %v2950_v58 = vround.rtne.f32 %v845_v36  ;;  %v61_v36 = vunpack.c.l.bf16 %v3394_v3  ;;  %v3107_v3 = vld [vmem:[#allocation5 + $0x3f0] sm:$0xff]  }
  0x62   :  { %2736 = vmatpush3.bf16.msra.mxu0 %v3044_v44  ;;  %v3061_v44 = vld [vmem:[#allocation5 + $0x290] sm:$0xff]   ;;  %v3424_v60 = vmul.f32 0.125, %v2948_v41 }
  0x63   :  { %2758 = vmatpush3.bf16.msra.mxu1 %v3045_v50  ;;  %2737 = vmatprep.subr.bf16.mxu0 %v3046_v54  ;;  %v2956_v50 = vround.rtne.f32 %v851_v25  ;;  %v3063_v54 = vld [vmem:[#allocation5 + $0x2d8] sm:$0xff]   ;;  %v3428_v7 = vmul.f32 0.125, %v2950_v58  ;;  %v67_v25 = vunpack.c.l.bf16 %v3390_v63 }
  0x64   :  { %2759 = vmatprep.subr.bf16.mxu1 %v3047_v57  ;;  %v3422_v57 = vmul.f32 0.125, %v2953_v31 }
  0x65   :  { %v3426_v1 = vmul.f32 0.125, %v2956_v50  ;;  %v1631_v41 = vmul.f32 4.0, %v67_v25 }
  0x66   :  { %2738 = vmatpush3.bf16.msra.mxu0 %v3048_v59  ;;  %v3064_v59 = vld [vmem:[#allocation5 + $0x218] sm:$0xff]  }
  0x67   :  { %2760 = vmatpush3.bf16.msra.mxu1 %v3049_v61  ;;  %2767 = vmatprep.subr.bf16.mxu0 %v3050_v9  ;;  %v2958_v61 = vround.rtne.f32 %v853_v42  ;;  %v69_v42 = vunpack.c.l.bf16 %v3396_v4  ;;  %v2971_v58 = vround.rtne.f32 %v1631_v41  ;;  %v3109_v4 = vld [vmem:[#allocation5 + $0x3b0] sm:$0xff]  }
  0x68   :  { %2789 = vmatprep.subr.bf16.mxu1 %v3051_v10 }
  0x69   :  { %745 = vmatmul.mubr.bf16.vlgmr.msra.gmra.mrb[4].mxu0 %v2466_v5  ;;  %v1624_v5 = vmul.f32 4.0, %v60_v14  ;;  %v3430_v9 = vmul.f32 0.125, %v2958_v61  ;;  %v1626_v14 = vmul.f32 4.0, %v62_v33  ;;  %v3075_v33 = vld [vmem:[#allocation5 + $0x2f0] sm:$0xff]   ;;  %v3080_v61 = vld [vmem:[#allocation5 + $0x238] sm:$0xff]  }
  0x6a   :  { %786 = vmatmul.mubr.bf16.vlgmr.msra.gmra.mrb[4].mxu1 %v2468_v8  ;;  %2768 = vmatpush3.bf16.msra.mxu0 %v3052_v12  ;;  %v3068_v8 = vld [vmem:[#allocation5 + $0x220] sm:$0xff]   ;;  %v1632_v12 = vmul.f32 4.0, %v68_v15  ;;  %v3074_v15 = vld [vmem:[#allocation5 + $0x270] sm:$0xff]  }
  0x6b   :  { %2790 = vmatpush3.bf16.msra.mxu1 %v3053_v45  ;;  %1443 = vmatprep.mubr.bf16.mxu0 %v887_v11  ;;  %v2964_v10 = vround.rtne.f32 %v1624_v5  ;;  %v3069_v11 = vld [vmem:[#allocation5 + $0x2a0] sm:$0xff]   ;;  %v3071_v45 = vld [vmem:[#allocation5 + $0x2e8] sm:$0xff]   ;;  %v2966_v23 = vround.rtne.f32 %v1626_v14  ;;  %v886_v5 = vpack.c.bf16 %v3418_v46, %v3416_v28  ;;  %v893_v46 = vpack.c.bf16 %v3430_v9, %v3428_v7  ;;  %v3090_v7 = vld [vmem:[#allocation5 + $0x350] sm:$0xff]  }
  0x6c   :  { %2769 = vmatprep.subr.bf16.mxu0 %v3054_v17  ;;  %1484 = vmatprep.mubr.bf16.mxu1 %v889_v13  ;;  %v3070_v13 = vld [vmem:[#allocation5 + $0x268] sm:$0xff]   ;;  %v2972_v16 = vround.rtne.f32 %v1632_v12  ;;  %v59_v17 = vunpack.c.l.bf16 %v3388_v62  ;;  %v3084_v28 = vld [vmem:[#allocation5 + $0x300] sm:$0xff]   ;;  %v3091_v9 = vld [vmem:[#allocation5 + $0x3d0] sm:$0xff]  }
  0x6d   :  { %2791 = vmatprep.subr.bf16.mxu1 %v3055_v21  ;;  %v3432_v32 = vmul.f32 0.25, %v2964_v10  ;;  %v3073_v21 = vld [vmem:[#allocation5 + $0x2a8] sm:$0xff]   ;;  %v3442_v35 = vmul.f32 0.25, %v2966_v23  ;;  %v888_v10 = vpack.c.bf16 %v3422_v57, %v3420_v53  ;;  %v3085_v53 = vld [vmem:[#allocation5 + $0x380] sm:$0xff]   ;;  %v3092_v23 = vld [vmem:[#allocation5 + $0x310] sm:$0xff]  }
  0x6e   :  { %2770 = vmatpush3.bf16.msra.mxu0 %v3056_v47  ;;  %v3435_v47 = vmul.f32 0.25, %v2972_v16  ;;  %v1623_v51 = vmul.f32 4.0, %v59_v17  ;;  %v3086_v57 = vld [vmem:[#allocation5 + $0x348] sm:$0xff]   ;;  %v842_v41 = vmul.f32 8.0, %v59_v17 }
  0x6f   :  { %2792 = vmatpush3.bf16.msra.mxu1 %v3057_v34  ;;  %2771 = vmatprep.subr.bf16.mxu0 %v3058_v27  ;;  %v2974_v34 = vround.rtne.f32 %v1634_v20  ;;  %v3088_v20 = vld [vmem:[#allocation5 + $0x308] sm:$0xff]  }
  0x70   :  { %2793 = vmatprep.subr.bf16.mxu1 %v3059_v55  ;;  %v1672_v27 = vpack.c.bf16 %v3435_v47, %v3432_v32  ;;  %v2963_v31 = vround.rtne.f32 %v1623_v51  ;;  %v3095_v51 = vld [vmem:[#allocation5 + $0x3d8] sm:$0xff]   ;;  %v3104_v62 = vld [vmem:[#allocation5 + $0x328] sm:$0xff]  }
  0x71   :  { %v3444_v55 = vmul.f32 0.25, %v2974_v34  ;;  %v3094_v34 = vld [vmem:[#allocation5 + $0x358] sm:$0xff]  }
  0x72   :  { %2772 = vmatpush3.bf16.msra.mxu0 %v3060_v38  ;;  %v3077_v38 = vld [vmem:[#allocation5 + $0x2b0] sm:$0xff]   ;;  %v3159_v32 = vld [vmem:[#allocation5 + $0x5d8] sm:$0xff]  }
  0x73   :  { %2794 = vmatpush3.bf16.msra.mxu1 %v3061_v44  ;;  %2773 = vmatprep.subr.bf16.mxu0 %v3062_v52  ;;  %v3078_v44 = vld [vmem:[#allocation5 + $0x278] sm:$0xff]   ;;  %v1674_v50 = vpack.c.bf16 %v3444_v55, %v3442_v35  ;;  %v3452_v52 = vmul.f32 0.25, %v2963_v31  ;;  %v3098_v31 = vld [vmem:[#allocation5 + $0x360] sm:$0xff]  }
  0x74   :  { %2795 = vmatprep.subr.bf16.mxu1 %v3063_v54  ;;  %v3079_v54 = vld [vmem:[#allocation5 + $0x2f8] sm:$0xff]   ;;  %v3162_v35 = vld [vmem:[#allocation5 + $0x560] sm:$0xff]  }
  0x75   :  { %v3160_v47 = vld [vmem:[#allocation5 + $0x518] sm:$0xff]   ;;  %v3163_v55 = vld [vmem:[#allocation5 + $0x5e0] sm:$0xff]  }
  0x76   :  { %2774 = vmatpush3.bf16.msra.mxu0 %v3064_v59  ;;  %v1625_v59 = vmul.f32 4.0, %v61_v36 }
  0x77   :  { %2796 = vmatpush3.bf16.msra.mxu1 %v3065_v0  ;;  %2775 = vmatprep.subr.bf16.mxu0 %v3066_v2  ;;  %v1633_v0 = vmul.f32 4.0, %v69_v42  ;;  %v3081_v2 = vld [vmem:[#allocation5 + $0x2b8] sm:$0xff]  }
  0x78   :  { %2797 = vmatprep.subr.bf16.mxu1 %v3067_v6  ;;  %v3460_v6 = vmul.f32 0.25, %v2971_v58  ;;  %v3101_v58 = vld [vmem:[#allocation5 + $0x3a0] sm:$0xff]  }
  0x79   :  { %v2973_v12 = vround.rtne.f32 %v1633_v0  ;;  %v852_v0 = vmul.f32 8.0, %v69_v42 }
  0x7a   :  { %2776 = vmatpush3.bf16.msra.mxu0 %v3068_v8  ;;  %v2965_v8 = vround.rtne.f32 %v1625_v59  ;;  %v1671_v16 = vpack.c.bf16 %v3460_v6, %v3452_v52  ;;  %v844_v59 = vmul.f32 8.0, %v61_v36 }
  0x7b   :  { %2798 = vmatpush3.bf16.msra.mxu1 %v3069_v11  ;;  %2777 = vmatprep.subr.bf16.mxu0 %v3070_v13  ;;  %v3082_v11 = vld [vmem:[#allocation5 + $0x340] sm:$0xff]  }
  0x7c   :  { %2799 = vmatprep.subr.bf16.mxu1 %v3071_v45  ;;  %v3083_v13 = vld [vmem:[#allocation5 + $0x3c0] sm:$0xff]   ;;  %v891_v45 = vpack.c.bf16 %v3426_v1, %v3424_v60  ;;  %v3468_v14 = vmul.f32 0.25, %v2965_v8  ;;  %v3087_v1 = vld [vmem:[#allocation5 + $0x3c8] sm:$0xff]   ;;  %v2949_v63 = vround.rtne.f32 %v844_v59 }
  0x7d   :  { %v3105_v8 = vld [vmem:[#allocation5 + $0x3a8] sm:$0xff]  }
  0x7e   :  { %2778 = vmatpush3.bf16.msra.mxu0 %v3072_v19  ;;  %v3472_v19 = vmul.f32 0.25, %v2973_v12  ;;  %v876_v42 = vmul.f32 0.125, %v2949_v63  ;;  %v3136_v59 = vld [vmem:[#allocation5 + $0x428] sm:$0xff]   ;;  %v3144_v63 = vld [vmem:[#allocation5 + $0x438] sm:$0xff]  }
  0x7f   :  { %2800 = vmatpush3.bf16.msra.mxu1 %v3073_v21  ;;  %2779 = vmatprep.subr.bf16.mxu0 %v3074_v15  ;;  %v3089_v21 = vld [vmem:[#allocation5 + $0x388] sm:$0xff]   ;;  %v3093_v15 = vld [vmem:[#allocation5 + $0x390] sm:$0xff]  }
  0x80   :  { %2801 = vmatprep.subr.bf16.mxu1 %v3075_v33  ;;  %v1673_v60 = vpack.c.bf16 %v3472_v19, %v3468_v14  ;;  %v3096_v33 = vld [vmem:[#allocation5 + $0x318] sm:$0xff]  }
  0x82   :  { %2780 = vmatpush3.bf16.msra.mxu0 %v3076_v24  ;;  %v3097_v24 = vld [vmem:[#allocation5 + $0x398] sm:$0xff]  }
  0x83   :  { %2802 = vmatpush3.bf16.msra.mxu1 %v3077_v38  ;;  %2781 = vmatprep.subr.bf16.mxu0 %v3078_v44  ;;  %v3099_v38 = vld [vmem:[#allocation5 + $0x3e0] sm:$0xff]  }
  0x84   :  { %2803 = vmatprep.subr.bf16.mxu1 %v3079_v54  ;;  %v3100_v44 = vld [vmem:[#allocation5 + $0x320] sm:$0xff]   ;;  %v850_v54 = vmul.f32 8.0, %v67_v25  ;;  %v3106_v25 = vld [vmem:[#allocation5 + $0x370] sm:$0xff]  }
  0x86   :  { %2782 = vmatpush3.bf16.msra.mxu0 %v3080_v61  ;;  %v3102_v61 = vld [vmem:[#allocation5 + $0x368] sm:$0xff]   ;;  %v2955_v17 = vround.rtne.f32 %v850_v54 }
  0x87   :  { %2804 = vmatpush3.bf16.msra.mxu1 %v3081_v2  ;;  %2811 = vmatprep.subr.bf16.mxu0 %v3082_v11  ;;  %v3103_v2 = vld [vmem:[#allocation5 + $0x3e8] sm:$0xff]   ;;  %v3108_v11 = vld [vmem:[#allocation5 + $0x330] sm:$0xff]  }
  0x88   :  { %2833 = vmatprep.subr.bf16.mxu1 %v3083_v13  ;;  %v882_v12 = vmul.f32 0.125, %v2955_v17  ;;  %v3110_v13 = vld [vmem:[#allocation5 + $0x378] sm:$0xff]   ;;  %v3134_v54 = vld [vmem:[#allocation5 + $0x468] sm:$0xff]  }
  0x89   :  { %1444 = vmatmul.mubr.bf16.vlgmr.msra.gmra.mrb[8].mxu0 %v886_v5  ;;  %v2947_v5 = vround.rtne.f32 %v842_v41  ;;  %v3126_v41 = vld [vmem:[#allocation5 + $0x458] sm:$0xff]  }
  0x8a   :  { %1485 = vmatmul.mubr.bf16.vlgmr.msra.gmra.mrb[8].mxu1 %v888_v10  ;;  %2812 = vmatpush3.bf16.msra.mxu0 %v3084_v28  ;;  %v2957_v10 = vround.rtne.f32 %v852_v0  ;;  %v3111_v28 = vld [vmem:[#allocation5 + $0x3f8] sm:$0xff]   ;;  %v3138_v0 = vld [vmem:[#allocation5 + $0x470] sm:$0xff]  }
  0x8b   :  { %2834 = vmatpush3.bf16.msra.mxu1 %v3085_v53  ;;  %1525 = vmatprep.mubr.bf16.mxu0 %v891_v45  ;;  %v874_v36 = vmul.f32 0.125, %v2947_v5  ;;  %v3113_v53 = vld [vmem:[#allocation5 + $0x3b8] sm:$0xff]   ;;  %v3140_v5 = vld [vmem:[#allocation5 + $0x430] sm:$0xff]  }
  0x8c   :  { %2813 = vmatprep.subr.bf16.mxu0 %v3086_v57  ;;  %1566 = vmatprep.mubr.bf16.mxu1 %v893_v46  ;;  %v884_v45 = vmul.f32 0.125, %v2957_v10  ;;  %v3112_v46 = vld [vmem:[#allocation5 + $0x338] sm:$0xff]   ;;  %v3146_v10 = vld [vmem:[#allocation5 + $0x540] sm:$0xff]  }
  0x8d   :  { %2835 = vmatprep.subr.bf16.mxu1 %v3087_v1  ;;  %v890_v57 = vpack.c.bf16 %v882_v12, %v874_v36  ;;  %v3142_v17 = vld [vmem:[#allocation5 + $0x478] sm:$0xff]   ;;  %v3148_v36 = vld [vmem:[#allocation5 + $0x500] sm:$0xff]   ;;  %v3150_v12 = vld [vmem:[#allocation5 + $0x548] sm:$0xff]  }
  0x8e   :  { %2814 = vmatpush3.bf16.msra.mxu0 %v3088_v20  ;;  %v892_v1 = vpack.c.bf16 %v884_v45, %v876_v42  ;;  %v3114_v20 = vld [vmem:[#allocation5 + $0x440] sm:$0xff]   ;;  %v3152_v42 = vld [vmem:[#allocation5 + $0x508] sm:$0xff]  }
  0x8f   :  { %2836 = vmatpush3.bf16.msra.mxu1 %v3089_v21  ;;  %2815 = vmatprep.subr.bf16.mxu0 %v3090_v7  ;;  %v3115_v21 = vld [vmem:[#allocation5 + $0x4c0] sm:$0xff]   ;;  %v3166_v45 = vld [vmem:[#allocation5 + $0x568] sm:$0xff]  }
  0x90   :  { %2837 = vmatprep.subr.bf16.mxu1 %v3091_v9  ;;  %v3116_v7 = vld [vmem:[#allocation5 + $0x400] sm:$0xff]  }
  0x91   :  { %v3117_v9 = vld [vmem:[#allocation5 + $0x480] sm:$0xff]  }
  0x92   :  { %2816 = vmatpush3.bf16.msra.mxu0 %v3092_v23  ;;  %v3118_v23 = vld [vmem:[#allocation5 + $0x448] sm:$0xff]  }
  0x93   :  { %2838 = vmatpush3.bf16.msra.mxu1 %v3093_v15  ;;  %2817 = vmatprep.subr.bf16.mxu0 %v3094_v34  ;;  %v3119_v15 = vld [vmem:[#allocation5 + $0x4c8] sm:$0xff]  }
  0x94   :  { %2839 = vmatprep.subr.bf16.mxu1 %v3095_v51  ;;  %v3120_v34 = vld [vmem:[#allocation5 + $0x408] sm:$0xff]  }
  0x95   :  { %v3121_v51 = vld [vmem:[#allocation5 + $0x488] sm:$0xff]  }
  0x96   :  { %2818 = vmatpush3.bf16.msra.mxu0 %v3096_v33  ;;  %v3122_v33 = vld [vmem:[#allocation5 + $0x450] sm:$0xff]  }
  0x97   :  { %2840 = vmatpush3.bf16.msra.mxu1 %v3097_v24  ;;  %2819 = vmatprep.subr.bf16.mxu0 %v3098_v31  ;;  %v3123_v24 = vld [vmem:[#allocation5 + $0x4d0] sm:$0xff]  }
  0x98   :  { %2841 = vmatprep.subr.bf16.mxu1 %v3099_v38  ;;  %v3124_v31 = vld [vmem:[#allocation5 + $0x410] sm:$0xff]  }
  0x99   :  { %v3125_v38 = vld [vmem:[#allocation5 + $0x490] sm:$0xff]  }
  0x9a   :  { %2820 = vmatpush3.bf16.msra.mxu0 %v3100_v44  ;;  %v3133_v44 = vld [vmem:[#allocation5 + $0x4a0] sm:$0xff]  }
  0x9b   :  { %2842 = vmatpush3.bf16.msra.mxu1 %v3101_v58  ;;  %2821 = vmatprep.subr.bf16.mxu0 %v3102_v61  ;;  %v3135_v58 = vld [vmem:[#allocation5 + $0x4e8] sm:$0xff]  }
  0x9c   :  { %2843 = vmatprep.subr.bf16.mxu1 %v3103_v2  ;;  %v3137_v61 = vld [vmem:[#allocation5 + $0x4a8] sm:$0xff]   ;;  %v3139_v2 = vld [vmem:[#allocation5 + $0x4f0] sm:$0xff]  }
  0x9e   :  { %2822 = vmatpush3.bf16.msra.mxu0 %v3104_v62  ;;  %v3141_v62 = vld [vmem:[#allocation5 + $0x4b0] sm:$0xff]  }
  0x9f   :  { %2844 = vmatpush3.bf16.msra.mxu1 %v3105_v8  ;;  %2823 = vmatprep.subr.bf16.mxu0 %v3106_v25  ;;  %v3143_v8 = vld [vmem:[#allocation5 + $0x4f8] sm:$0xff]  }
  0xa0   :  { %2845 = vmatprep.subr.bf16.mxu1 %v3107_v3  ;;  %v3145_v25 = vld [vmem:[#allocation5 + $0x4b8] sm:$0xff]   ;;  %v3147_v3 = vld [vmem:[#allocation5 + $0x5c0] sm:$0xff]  }
  0xa2   :  { %2824 = vmatpush3.bf16.msra.mxu0 %v3108_v11  ;;  %v3149_v11 = vld [vmem:[#allocation5 + $0x580] sm:$0xff]  }
  0xa3   :  { %2846 = vmatpush3.bf16.msra.mxu1 %v3109_v4  ;;  %2825 = vmatprep.subr.bf16.mxu0 %v3110_v13  ;;  %v3151_v4 = vld [vmem:[#allocation5 + $0x5c8] sm:$0xff]   ;;  %v3165_v13 = vld [vmem:[#allocation5 + $0x5a0] sm:$0xff]  }
  0xa4   :  { %2847 = vmatprep.subr.bf16.mxu1 %v3111_v28  ;;  %v3167_v28 = vld [vmem:[#allocation5 + $0x5e8] sm:$0xff]  }
  0xa6   :  { %2826 = vmatpush3.bf16.msra.mxu0 %v3112_v46  ;;  %v3168_v46 = vld [vmem:[#allocation5 + $0x528] sm:$0xff]  }
  0xa7   :  { %2848 = vmatpush3.bf16.msra.mxu1 %v3113_v53  ;;  %2855 = vmatprep.subr.bf16.mxu0 %v3114_v20  ;;  %v3169_v53 = vld [vmem:[#allocation5 + $0x5a8] sm:$0xff]   ;;  %v3172_v20 = vld [vmem:[#allocation5 + $0x530] sm:$0xff]  }
  0xa8   :  { %2877 = vmatprep.subr.bf16.mxu1 %v3115_v21  ;;  %v3173_v21 = vld [vmem:[#allocation5 + $0x5b0] sm:$0xff]  }
  0xa9   :  { %1526 = vmatmul.mubr.bf16.vlgmr.msra.gmra.mrb[12].mxu0 %v890_v57  ;;  %v3170_v57 = vld [vmem:[#allocation5 + $0x570] sm:$0xff]  }
  0xaa   :  { %1567 = vmatmul.mubr.bf16.vlgmr.msra.gmra.mrb[12].mxu1 %v892_v1  ;;  %2856 = vmatpush3.bf16.msra.mxu0 %v3116_v7  ;;  %v3171_v1 = vld [vmem:[#allocation5 + $0x5f0] sm:$0xff]   ;;  %v3174_v7 = vld [vmem:[#allocation5 + $0x578] sm:$0xff]  }
  0xab   :  { %2878 = vmatpush3.bf16.msra.mxu1 %v3117_v9  ;;  %2224 = vmatprep.mubr.bf16.mxu0 %v1668_v29  ;;  %v3129_v29 = vld [vmem:[#allocation5 + $0x498] sm:$0xff]  }
  0xac   :  { %2857 = vmatprep.subr.bf16.mxu0 %v3118_v23  ;;  %2265 = vmatprep.mubr.bf16.mxu1 %v1670_v39  ;;  %v3132_v39 = vld [vmem:[#allocation5 + $0x420] sm:$0xff]   ;;  %v3175_v9 = vld [vmem:[#allocation5 + $0x5f8] sm:$0xff]  }
  0xad   :  { %2879 = vmatprep.subr.bf16.mxu1 %v3119_v15  ;;  %v3176_v23 = vld [vmem:[#allocation5 + $0x538] sm:$0xff]  }
  0xae   :  { %2858 = vmatpush3.bf16.msra.mxu0 %v3120_v34  ;;  %v3177_v15 = vld [vmem:[#allocation5 + $0x5b8] sm:$0xff]   ;;  %v72_v34 = vlaneseq }
  0xaf   :  { %2880 = vmatpush3.bf16.msra.mxu1 %v3121_v51  ;;  %2859 = vmatprep.subr.bf16.mxu0 %v3122_v33 }
  0xb0   :  { %2881 = vmatprep.subr.bf16.mxu1 %v3123_v24  ;;  %v3509_v51 = vshrl.u32 %v72_v34, 7  ;;  %v3515_v24 = vld [vmem:[%s3570_s2] sm:$0x7] }
  0xb2   :  { %2860 = vmatpush3.bf16.msra.mxu0 %v3124_v31  ;;  %v204_v33 = vsub.s32 0, %v3509_v51 }
  0xb3   :  { %2882 = vmatpush3.bf16.msra.mxu1 %v3125_v38  ;;  %2861 = vmatprep.subr.bf16.mxu0 %v3126_v41 }
  0xb4   :  { %2883 = vmatprep.subr.bf16.mxu1 %v3127_v18  ;;  %v205_v52 = vrot.slane %v3515_v24, %v204_v33 }
  0xb6   :  { %2862 = vmatpush3.bf16.msra.mxu0 %v3128_v22 }
  0xb7   :  { %2884 = vmatpush3.bf16.msra.mxu1 %v3129_v29  ;;  %2863 = vmatprep.subr.bf16.mxu0 %v3130_v26 }
  0xb8   :  { %2885 = vmatprep.subr.bf16.mxu1 %v3131_v30 }
  0xba   :  { %2864 = vmatpush3.bf16.msra.mxu0 %v3132_v39 }
  0xbb   :  { %2886 = vmatpush3.bf16.msra.mxu1 %v3133_v44  ;;  %2865 = vmatprep.subr.bf16.mxu0 %v3134_v54 }
  0xbc   :  { %2887 = vmatprep.subr.bf16.mxu1 %v3135_v58 }
  0xbe   :  { %2866 = vmatpush3.bf16.msra.mxu0 %v3136_v59 }
  0xbf   :  { %2888 = vmatpush3.bf16.msra.mxu1 %v3137_v61  ;;  %2867 = vmatprep.subr.bf16.mxu0 %v3138_v0 }
  0xc0   :  { %2889 = vmatprep.subr.bf16.mxu1 %v3139_v2 }
  0xc2   :  { %2868 = vmatpush3.bf16.msra.mxu0 %v3140_v5 }
  0xc3   :  { %2890 = vmatpush3.bf16.msra.mxu1 %v3141_v62  ;;  %2869 = vmatprep.subr.bf16.mxu0 %v3142_v17 }
  0xc4   :  { %2891 = vmatprep.subr.bf16.mxu1 %v3143_v8 }
  0xc6   :  { %2870 = vmatpush3.bf16.msra.mxu0 %v3144_v63 }
  0xc7   :  { %2892 = vmatpush3.bf16.msra.mxu1 %v3145_v25  ;;  %2899 = vmatprep.subr.bf16.mxu0 %v3146_v10 }
  0xc8   :  { %2921 = vmatprep.subr.bf16.mxu1 %v3147_v3 }
  0xc9   :  { %2225 = vmatmul.mubr.bf16.vlgmr.msra.gmra.mrb[16].mxu0 %v1667_v48  ;;  %v3156_v48 = vld [vmem:[#allocation5 + $0x510] sm:$0xff]  }
  0xca   :  { %2266 = vmatmul.mubr.bf16.vlgmr.msra.gmra.mrb[16].mxu1 %v1669_v56  ;;  %2900 = vmatpush3.bf16.msra.mxu0 %v3148_v36  ;;  %v3158_v56 = vld [vmem:[#allocation5 + $0x558] sm:$0xff]  }
  0xcb   :  { %2922 = vmatpush3.bf16.msra.mxu1 %v3149_v11  ;;  %2306 = vmatprep.mubr.bf16.mxu0 %v1672_v27  ;;  %v3161_v27 = vld [vmem:[#allocation5 + $0x598] sm:$0xff]  }
  0xcc   :  { %2901 = vmatprep.subr.bf16.mxu0 %v3150_v12  ;;  %2347 = vmatprep.mubr.bf16.mxu1 %v1674_v50  ;;  %v3164_v50 = vld [vmem:[#allocation5 + $0x520] sm:$0xff]  }
  0xcd   :  { %2923 = vmatprep.subr.bf16.mxu1 %v3151_v4  ;;  %v1025_v4 = vsub.s32 1, %v3509_v51 }
  0xce   :  { %2902 = vmatpush3.bf16.msra.mxu0 %v3152_v42 }
  0xcf   :  { %2924 = vmatpush3.bf16.msra.mxu1 %v3153_v37  ;;  %2903 = vmatprep.subr.bf16.mxu0 %v3154_v40  ;;  %v1026_v37 = vrot.slane %v3515_v24, %v1025_v4 }
  0xd0   :  { %2925 = vmatprep.subr.bf16.mxu1 %v3155_v43 }
  0xd2   :  { %2904 = vmatpush3.bf16.msra.mxu0 %v3156_v48 }
  0xd3   :  { %2926 = vmatpush3.bf16.msra.mxu1 %v3157_v49  ;;  %2905 = vmatprep.subr.bf16.mxu0 %v3158_v56 }
  0xd4   :  { %2927 = vmatprep.subr.bf16.mxu1 %v3159_v32 }
  0xd6   :  { %2906 = vmatpush3.bf16.msra.mxu0 %v3160_v47 }
  0xd7   :  { %2928 = vmatpush3.bf16.msra.mxu1 %v3161_v27  ;;  %2907 = vmatprep.subr.bf16.mxu0 %v3162_v35 }
  0xd8   :  { %2929 = vmatprep.subr.bf16.mxu1 %v3163_v55 }
  0xda   :  { %2908 = vmatpush3.bf16.msra.mxu0 %v3164_v50 }
  0xdb   :  { %2930 = vmatpush3.bf16.msra.mxu1 %v3165_v13  ;;  %2909 = vmatprep.subr.bf16.mxu0 %v3166_v45 }
  0xdc   :  { %2931 = vmatprep.subr.bf16.mxu1 %v3167_v28 }
  0xde   :  { %2910 = vmatpush3.bf16.msra.mxu0 %v3168_v46 }
  0xdf   :  { %2932 = vmatpush3.bf16.msra.mxu1 %v3169_v53  ;;  %2911 = vmatprep.subr.bf16.mxu0 %v3170_v57 }
  0xe0   :  { %2933 = vmatprep.subr.bf16.mxu1 %v3171_v1 }
  0xe2   :  { %2912 = vmatpush3.bf16.msra.mxu0 %v3172_v20 }
  0xe3   :  { %2934 = vmatpush3.bf16.msra.mxu1 %v3173_v21  ;;  %2913 = vmatprep.subr.bf16.mxu0 %v3174_v7 }
  0xe4   :  { %2935 = vmatprep.subr.bf16.mxu1 %v3175_v9 }
  0xe6   :  { %2914 = vmatpush3.bf16.msra.mxu0 %v3176_v23 }
  0xe7   :  { %2936 = vmatpush3.bf16.msra.mxu1 %v3177_v15 }
  0xe9   :  { %2307 = vmatmul.mubr.bf16.vlgmr.msra.gmra.mrb[20].mxu0 %v1671_v16 }
  0xea   :  { %2348 = vmatmul.mubr.bf16.vlgmr.msra.gmra.mrb[20].mxu1 %v1673_v60 }
 0x11c   :  { %v2695_v31 = vpop.f32.mrb[0].mxu0 }
 0x11d   :  { %v2717_v38 = vpop.f32.mrb[0].mxu1  ;;  %v2696_v6 = vpop.f32.mrb[1].mxu0 }
 0x11e   :  { %v2718_v16 = vpop.f32.mrb[1].mxu1  ;;  %v2697_v41 = vadd.f32 %v2696_v6, %v2695_v31  ;;  %v2698_v19 = vpop.f32.mrb[2].mxu0 }
 0x11f   :  { %v2719_v14 = vadd.f32 %v2718_v16, %v2717_v38  ;;  %v2720_v60 = vpop.f32.mrb[2].mxu1  ;;  %v2699_v18 = vpop.f32.mrb[3].mxu0 }
 0x120   :  { %v2721_v22 = vpop.f32.mrb[3].mxu1  ;;  %v665_v29 = vadd.f32 %v2697_v41, %v205_v52  ;;  %v2700_v26 = vadd.f32 %v2699_v18, %v2698_v19 }
 0x121   :  { %v2722_v30 = vadd.f32 %v2721_v22, %v2720_v60 }
 0x122   :  { %v706_v39 = vadd.f32 %v2719_v14, %v665_v29  ;;  %v668_v44 = vadd.f32 %v2700_v26, %v205_v52  ;;  %v1806_v14 = vsub.s32 2, %v3509_v51 }
 0x124   :  { %v709_v54 = vadd.f32 %v2722_v30, %v668_v44  ;;  %v1807_v60 = vrot.slane %v3515_v24, %v1806_v14 }
 0x13c   :  { %v2739_v58 = vpop.f32.mrb[4].mxu0 }
 0x13d   :  { %v2761_v59 = vpop.f32.mrb[4].mxu1  ;;  %v2740_v61 = vpop.f32.mrb[5].mxu0 }
 0x13e   :  { %v2762_v0 = vpop.f32.mrb[5].mxu1  ;;  %v2741_v2 = vadd.f32 %v2740_v61, %v2739_v58  ;;  %v2742_v62 = vpop.f32.mrb[6].mxu0 }
 0x13f   :  { %v2763_v5 = vadd.f32 %v2762_v0, %v2761_v59  ;;  %v2764_v17 = vpop.f32.mrb[6].mxu1  ;;  %v2743_v8 = vpop.f32.mrb[7].mxu0 }
 0x140   :  { %v2765_v63 = vpop.f32.mrb[7].mxu1  ;;  %v747_v25 = vadd.f32 %v2741_v2, %v706_v39  ;;  %v2744_v10 = vadd.f32 %v2743_v8, %v2742_v62 }
 0x141   :  { %v2766_v3 = vadd.f32 %v2765_v63, %v2764_v17 }
 0x142   :  { %v750_v36 = vadd.f32 %v2744_v10, %v709_v54  ;;  %v3518_v11 = vadd.f32 %v2763_v5, %v747_v25 }
 0x144   :  { %794 = vmax.xlane.f32.xlu0 %v3518_v11  ;;  %v3521_v12 = vadd.f32 %v2766_v3, %v750_v36 }
 0x148   :  { %796 = vmax.xlane.f32.xlu0 %v3521_v12 }
 0x15c   :  { %v2783_v42 = vpop.f32.mrb[8].mxu0 }
 0x15d   :  { %v2805_v40 = vpop.f32.mrb[8].mxu1  ;;  %v2784_v43 = vpop.f32.mrb[9].mxu0 }
 0x15e   :  { %v2785_v48 = vadd.f32 %v2784_v43, %v2783_v42  ;;  %v2806_v49 = vpop.f32.mrb[9].mxu1  ;;  %v2786_v56 = vpop.f32.mrb[10].mxu0 }
 0x15f   :  { %v2807_v32 = vadd.f32 %v2806_v49, %v2805_v40  ;;  %v2808_v47 = vpop.f32.mrb[10].mxu1  ;;  %v2787_v27 = vpop.f32.mrb[11].mxu0 }
 0x160   :  { %v1446_v35 = vadd.f32 %v2785_v48, %v1026_v37  ;;  %v2788_v55 = vadd.f32 %v2787_v27, %v2786_v56  ;;  %v2809_v50 = vpop.f32.mrb[11].mxu1  ;;  %v3529_v56 = vand.u32 127, %v72_v34 }
 0x161   :  { %v2810_v13 = vadd.f32 %v2809_v50, %v2808_v47 }
 0x162   :  { %v1487_v45 = vadd.f32 %v2807_v32, %v1446_v35  ;;  %v1449_v28 = vadd.f32 %v2788_v55, %v1026_v37 }
 0x164   :  { %v1490_v46 = vadd.f32 %v2810_v13, %v1449_v28 }
 0x17c   :  { %v2827_v53 = vpop.f32.mrb[12].mxu0 }
 0x17d   :  { %v2849_v57 = vpop.f32.mrb[12].mxu1  ;;  %v2828_v1 = vpop.f32.mrb[13].mxu0 }
 0x17e   :  { %v2829_v20 = vadd.f32 %v2828_v1, %v2827_v53  ;;  %v2850_v21 = vpop.f32.mrb[13].mxu1  ;;  %v2830_v7 = vpop.f32.mrb[14].mxu0 }
 0x17f   :  { %v2851_v9 = vadd.f32 %v2850_v21, %v2849_v57  ;;  %v2852_v23 = vpop.f32.mrb[14].mxu1  ;;  %v2831_v15 = vpop.f32.mrb[15].mxu0 }
 0x180   :  { %v1528_v33 = vadd.f32 %v2829_v20, %v1487_v45  ;;  %v2832_v31 = vadd.f32 %v2831_v15, %v2830_v7  ;;  %v2853_v38 = vpop.f32.mrb[15].mxu1 }
 0x181   :  { %v2854_v52 = vadd.f32 %v2853_v38, %v2852_v23 }
 0x182   :  { %v1531_v6 = vadd.f32 %v2832_v31, %v1490_v46  ;;  %v1569_v16 = vadd.f32 %v2851_v9, %v1528_v33 }
 0x184   :  { %1575 = vmax.xlane.f32.xlu1 %v1569_v16  ;;  %v1572_v41 = vadd.f32 %v2854_v52, %v1531_v6 }
 0x188   :  { %1577 = vmax.xlane.f32.xlu1 %v1572_v41 }
 0x19c   :  { %v2871_v19 = vpop.f32.mrb[16].mxu0 }
 0x19d   :  { %v2893_v18 = vpop.f32.mrb[16].mxu1  ;;  %v2872_v22 = vpop.f32.mrb[17].mxu0 }
 0x19e   :  { %v2873_v29 = vadd.f32 %v2872_v22, %v2871_v19  ;;  %v2894_v26 = vpop.f32.mrb[17].mxu1  ;;  %v2874_v30 = vpop.f32.mrb[18].mxu0 }
 0x19f   :  { %v2895_v39 = vadd.f32 %v2894_v26, %v2893_v18  ;;  %v2896_v44 = vpop.f32.mrb[18].mxu1  ;;  %v2875_v54 = vpop.f32.mrb[19].mxu0 }
 0x1a0   :  { %v2227_v58 = vadd.f32 %v2873_v29, %v1807_v60  ;;  %v2876_v59 = vadd.f32 %v2875_v54, %v2874_v30  ;;  %v2897_v61 = vpop.f32.mrb[19].mxu1 }
 0x1a1   :  { %v2898_v0 = vadd.f32 %v2897_v61, %v2896_v44 }
 0x1a2   :  { %v2268_v2 = vadd.f32 %v2895_v39, %v2227_v58  ;;  %v2230_v5 = vadd.f32 %v2876_v59, %v1807_v60 }
 0x1a4   :  { %v2271_v62 = vadd.f32 %v2898_v0, %v2230_v5 }
 0x1bc   :  { %v2915_v17 = vpop.f32.mrb[20].mxu0 }
 0x1bd   :  { %v2937_v51 = vpop.f32.mrb[20].mxu1  ;;  %v2916_v8 = vpop.f32.mrb[21].mxu0 }
 0x1be   :  { %v2917_v63 = vadd.f32 %v2916_v8, %v2915_v17  ;;  %v2938_v24 = vpop.f32.mrb[21].mxu1  ;;  %v2918_v25 = vpop.f32.mrb[22].mxu0 }
 0x1bf   :  { %v2939_v10 = vadd.f32 %v2938_v24, %v2937_v51  ;;  %v2940_v3 = vpop.f32.mrb[22].mxu1  ;;  %v2919_v36 = vpop.f32.mrb[23].mxu0  ;;  %v3256_v51 = vmov 0  }
 0x1c0   :  { %v2309_v4 = vadd.f32 %v2917_v63, %v2268_v2  ;;  %v2920_v42 = vadd.f32 %v2919_v36, %v2918_v25  ;;  %v2941_v37 = vpop.f32.mrb[23].mxu1  ;;  %2985 = vset.pattern.permute.xlu1 %v3256_v51  ;;  %2984 = vset.pattern.permute.xlu0 %v3256_v51 }
 0x1c1   :  { %v2942_v40 = vadd.f32 %v2941_v37, %v2940_v3  ;;  %v2406_v37 = vld [vmem:[%s3571_s3] sm:$0xff] }
 0x1c2   :  { %v2312_v43 = vadd.f32 %v2920_v42, %v2271_v62  ;;  %v2350_v48 = vadd.f32 %v2939_v10, %v2309_v4  ;;  %vm2408_vm12 = vcmp.eq.s32.totalorder %v2406_v37, 1 }
 0x1c4   :  { %2356 = vmax.xlane.f32.xlu0 %v2350_v48  ;;  %v2353_v49 = vadd.f32 %v2942_v40, %v2312_v43 }
 0x1c6   :  { %2358 = vmax.xlane.f32.xlu1 %v2353_v49 }
 0x1d1   :  { %v795_v32 = vpop.xlane.xlu0 %794 }
 0x1d2   :  { %vm798_vm0 = vcmp.eq.f32.partialorder %v3518_v11, %v795_v32 }
 0x1d3   :  { %v800_v47 = vsel %vm798_vm0, %v3529_v56, 128 }
 0x1d4   :  { %v803_v27 = vshra.s32 %v800_v47, 16  ;;  %v802_v38 = vand.u32 65535, %v800_v47 }
 0x1d5   :  { %v797_v35 = vpop.xlane.xlu0 %796 }
 0x1d6   :  { %vm799_vm1 = vcmp.eq.f32.partialorder %v3521_v12, %v797_v35  ;;  %v805_v55 = vcvt.s32.f32 %v803_v27  ;;  %v2407_v35 = vld [vmem:[%s3571_s3 + $0x8] sm:$0xff]  ;;  %s3258_s3 = smov [#allocation7]  }
 0x1d7   :  { %v801_v50 = vsel %vm799_vm1, %v3529_v56, 128  ;;  %vm2409_vm15 = vcmp.eq.s32.totalorder %v2407_v35, 1  ;;  %s2449_s20 = sshll.u32 %s3258_s3, 4  ;;  %s2450_s20 = int_to_ptr.vmem [resolvable:$true] %s2449_s20 }
 0x1d8   :  { %806 = vmin.xlane.f32.xlu0 %v805_v55  ;;  %v817_v13 = vshra.s32 %v801_v50, 16  ;;  %v816_v52 = vand.u32 65535, %v801_v50  ;;  %s3222_s21 = scalar_lea.vmem %s2450_s20, 128  ;;  %p3227_p3 = scmp.lt.s32.totalorder %s2450_s20, %s2450_s20 }
 0x1d9   :  { %p3223_p2 = scmp.ne.s32.totalorder %s2450_s20, %s3222_s21  ;;  %p3228_p4 = scmp.lt.s32.totalorder %s3222_s21, %s3222_s21 }
 0x1da   :  { %v819_v45 = vcvt.s32.f32 %v817_v13  ;;  %v818_v19 = vcvt.s32.f32 %v816_v52 }
 0x1db   :  { %p3229_p5 = por %p3228_p4, %p3227_p3 }
 0x1dc   :  { %820 = vmin.xlane.f32.xlu1 %v819_v45 }
 0x1dd   :  { %p3230_p6 = pnand %p3229_p5, %p3223_p2 }
 0x211   :  { %v1576_v28 = vpop.xlane.xlu1 %1575 }
 0x212   :  { %vm1579_vm2 = vcmp.eq.f32.partialorder %v1569_v16, %v1576_v28  ;;  %v804_v16 = vcvt.s32.f32 %v802_v38  ;;  %v3257_v28 = vmov 0.0  }
 0x213   :  { %v1581_v34 = vsel %vm1579_vm2, %v3529_v56, 128  ;;  %vm2412_vm2 = vcmp.eq.s32.totalorder %v2406_v37, 2 }
 0x214   :  { %v1584_v46 = vshra.s32 %v1581_v34, 16  ;;  %v1583_v18 = vand.u32 65535, %v1581_v34 }
 0x215   :  { %v1578_v53 = vpop.xlane.xlu1 %1577 }
 0x216   :  { %vm1580_vm3 = vcmp.eq.f32.partialorder %v1572_v41, %v1578_v53  ;;  %v1586_v11 = vcvt.s32.f32 %v1584_v46  ;;  %v1585_v26 = vcvt.s32.f32 %v1583_v18 }
 0x217   :  { %v1582_v57 = vsel %vm1580_vm3, %v3529_v56, 128  ;;  %vm2413_vm3 = vcmp.eq.s32.totalorder %v2407_v35, 2 }
 0x218   :  { %1587 = vmin.xlane.f32.xlu0 %v1586_v11  ;;  %v1598_v1 = vshra.s32 %v1582_v57, 16  ;;  %v1597_v22 = vand.u32 65535, %v1582_v57 }
 0x21a   :  { %v1600_v12 = vcvt.s32.f32 %v1598_v1  ;;  %v1599_v44 = vcvt.s32.f32 %v1597_v22 }
 0x21c   :  { %1601 = vmin.xlane.f32.xlu1 %v1600_v12 }
 0x251   :  { %v2357_v20 = vpop.xlane.xlu0 %2356 }
 0x252   :  { %vm2360_vm4 = vcmp.eq.f32.partialorder %v2350_v48, %v2357_v20 }
 0x253   :  { %v2362_v21 = vsel %vm2360_vm4, %v3529_v56, 128  ;;  %v2359_v7 = vpop.xlane.xlu1 %2358 }
 0x254   :  { %vm2361_vm5 = vcmp.eq.f32.partialorder %v2353_v49, %v2359_v7  ;;  %v2365_v9 = vshra.s32 %v2362_v21, 16  ;;  %v2364_v58 = vand.u32 65535, %v2362_v21 }
 0x255   :  { %v2363_v23 = vsel %vm2361_vm5, %v3529_v56, 128 }
 0x256   :  { %v2367_v15 = vcvt.s32.f32 %v2365_v9  ;;  %v2379_v33 = vshra.s32 %v2363_v23, 16  ;;  %v2378_v59 = vand.u32 65535, %v2363_v23  ;;  %v2366_v0 = vcvt.s32.f32 %v2364_v58 }
 0x258   :  { %2368 = vmin.xlane.f32.xlu0 %v2367_v15  ;;  %v2381_v31 = vcvt.s32.f32 %v2379_v33  ;;  %v2380_v62 = vcvt.s32.f32 %v2378_v59 }
 0x25a   :  { %2382 = vmin.xlane.f32.xlu1 %v2381_v31 }
 0x265   :  { %v807_v6 = vpop.xlane.xlu0 %806 }
 0x266   :  { %vm808_vm6 = vcmp.eq.f32.partialorder %v805_v55, %v807_v6  ;;  %v813_v63 = vcvt.f32.s32 %v807_v6 }
 0x267   :  { %v809_v41 = vsel %vm808_vm6, %v804_v16, inf }
 0x268   :  { %810 = vmin.xlane.f32.xlu0 %v809_v41  ;;  %v814_v10 = vshll.u32 %v813_v63, 16 }
 0x269   :  { %v821_v14 = vpop.xlane.xlu1 %820 }
 0x26a   :  { %vm822_vm7 = vcmp.eq.f32.partialorder %v819_v45, %v821_v14  ;;  %v827_v3 = vcvt.f32.s32 %v821_v14 }
 0x26b   :  { %v823_v60 = vsel %vm822_vm7, %v818_v19, inf }
 0x26c   :  { %824 = vmin.xlane.f32.xlu1 %v823_v60  ;;  %v828_v43 = vshll.u32 %v827_v3, 16 }
 0x2a5   :  { %v1588_v29 = vpop.xlane.xlu0 %1587 }
 0x2a6   :  { %vm1589_vm8 = vcmp.eq.f32.partialorder %v1586_v11, %v1588_v29  ;;  %v1594_v36 = vcvt.f32.s32 %v1588_v29 }
 0x2a7   :  { %v1590_v30 = vsel %vm1589_vm8, %v1585_v26, inf }
 0x2a8   :  { %1591 = vmin.xlane.f32.xlu0 %v1590_v30  ;;  %v1595_v48 = vshll.u32 %v1594_v36, 16 }
 0x2a9   :  { %v1602_v39 = vpop.xlane.xlu1 %1601 }
 0x2aa   :  { %vm1603_vm9 = vcmp.eq.f32.partialorder %v1600_v12, %v1602_v39  ;;  %v1608_v49 = vcvt.f32.s32 %v1602_v39 }
 0x2ab   :  { %v1604_v54 = vsel %vm1603_vm9, %v1599_v44, inf }
 0x2ac   :  { %1605 = vmin.xlane.f32.xlu1 %v1604_v54  ;;  %v1609_v50 = vshll.u32 %v1608_v49, 16 }
 0x2e5   :  { %v2369_v61 = vpop.xlane.xlu0 %2368 }
 0x2e6   :  { %vm2370_vm10 = vcmp.eq.f32.partialorder %v2367_v15, %v2369_v61  ;;  %v2375_v21 = vcvt.f32.s32 %v2369_v61 }
 0x2e7   :  { %v2383_v2 = vpop.xlane.xlu1 %2382  ;;  %v2371_v5 = vsel %vm2370_vm10, %v2366_v0, inf }
 0x2e8   :  { %2372 = vmin.xlane.f32.xlu0 %v2371_v5  ;;  %vm2384_vm11 = vcmp.eq.f32.partialorder %v2381_v31, %v2383_v2  ;;  %v2389_v7 = vcvt.f32.s32 %v2383_v2  ;;  %v2376_v23 = vshll.u32 %v2375_v21, 16 }
 0x2e9   :  { %v2385_v17 = vsel %vm2384_vm11, %v2380_v62, inf }
 0x2ea   :  { %2386 = vmin.xlane.f32.xlu1 %v2385_v17  ;;  %v2390_v31 = vshll.u32 %v2389_v7, 16 }
 0x2f5   :  { %v811_v8 = vpop.xlane.xlu0 %810 }
 0x2f6   :  { %v812_v24 = vcvt.f32.s32 %v811_v8 }
 0x2f8   :  { %v815_v4 = vadd.s32 %v814_v10, %v812_v24 }
 0x2f9   :  { %v825_v25 = vpop.xlane.xlu1 %824 }
 0x2fa   :  { %v826_v42 = vcvt.f32.s32 %v825_v25  ;;  %vm830_vm13 = vcmp.eq.s32.totalorder %v3529_v56, %v815_v4 }
 0x2fb   :  { %v2534_v34 = vsel %vm830_vm13, 1.0, %v3257_v28 }
 0x2fc   :  { %v829_v47 = vadd.s32 %v828_v43, %v826_v42 }
 0x2fe   :  { %vm831_vm0 = vcmp.eq.s32.totalorder %v3529_v56, %v829_v47 }
 0x2ff   :  { %v2535_v1 = vsel %vm831_vm0, 1.0, %v3257_v28 }
 0x335   :  { %v1592_v40 = vpop.xlane.xlu0 %1591 }
 0x336   :  { %v1593_v32 = vcvt.f32.s32 %v1592_v40 }
 0x338   :  { %v1596_v27 = vadd.s32 %v1595_v48, %v1593_v32 }
 0x339   :  { %v1606_v55 = vpop.xlane.xlu1 %1605 }
 0x33a   :  { %vm1611_vm14 = vcmp.eq.s32.totalorder %v3529_v56, %v1596_v27  ;;  %v1607_v13 = vcvt.f32.s32 %v1606_v55  ;;  %v2410_v45 = vsel %vm2408_vm12, %v1596_v27, %v815_v4 }
 0x33b   :  { %v2600_v46 = vsel %vm1611_vm14, 1.0, %v3257_v28 }
 0x33c   :  { %v1610_v53 = vadd.s32 %v1609_v50, %v1607_v13  ;;  %v1617_v11 = vadd.f32 %v2600_v46, %v2534_v34 }
 0x33e   :  { %vm1612_vm1 = vcmp.eq.s32.totalorder %v3529_v56, %v1610_v53  ;;  %v2411_v57 = vsel %vm2409_vm15, %v1610_v53, %v829_v47 }
 0x33f   :  { %v2601_v12 = vsel %vm1612_vm1, 1.0, %v3257_v28 }
 0x340   :  { %v1618_v20 = vadd.f32 %v2601_v12, %v2535_v1 }
 0x375   :  { %v2373_v9 = vpop.xlane.xlu0 %2372 }
 0x376   :  { %v2374_v15 = vcvt.f32.s32 %v2373_v9 }
 0x377   :  { %v2387_v33 = vpop.xlane.xlu1 %2386 }
 0x378   :  { %v2377_v38 = vadd.s32 %v2376_v23, %v2374_v15  ;;  %v2388_v52 = vcvt.f32.s32 %v2387_v33 }
 0x37a   :  { %v2391_v6 = vadd.s32 %v2390_v31, %v2388_v52  ;;  %vm2392_vm4 = vcmp.eq.s32.totalorder %v3529_v56, %v2377_v38  ;;  %v2414_v16 = vsel %vm2412_vm2, %v2377_v38, %v2410_v45 }
 0x37b   :  { %v2666_v41 = vsel %vm2392_vm4, 1.0, %v3257_v28 }
 0x37c   :  { %v2398_v14 = vadd.f32 %v2666_v41, %v1617_v11  ;;  %vm2393_vm5 = vcmp.eq.s32.totalorder %v3529_v56, %v2391_v6  ;;  %v2415_v19 = vsel %vm2413_vm3, %v2391_v6, %v2411_v57 }
 0x37d   :  { %v2667_v60 = vsel %vm2393_vm5, 1.0, %v3257_v28 }
 0x37e   :  { %2400 = vmax.xlane.f32.xlu0 %v2398_v14  ;;  %v2399_v18 = vadd.f32 %v2667_v60, %v1618_v20 }
 0x380   :  { %2402 = vmax.xlane.f32.xlu1 %v2399_v18 }
 0x391   :  { %2420 = vperm.xlu1 %2985, %v2415_v19  }
 0x394   :  { %2417 = vperm.xlu0 %2984, %v2414_v16  }
 0x40b   :  { %v2401_v29 = vpop.xlane.xlu0 %2400 }
 0x40c   :  { %vm2404_vm8 = vcmp.eq.f32.partialorder %v2401_v29, 1.0 }
 0x40d   :  { %v2403_v22 = vpop.xlane.xlu1 %2402 }
 0x40e   :  { %vm2405_vm9 = vcmp.eq.f32.partialorder %v2403_v22, 1.0 }
 0x411   :  { %v2421_v26 = vpop.permute.xlu1 %2420 }
 0x412   :  { %vm2423_vm6 = vcmp.eq.s32.totalorder %v3529_v56, %v2421_v26 }
 0x413   :  { %v2669_v30 = vsel %vm2423_vm6, 1.0, %v3257_v28  ;;  %v2418_v39 = vpop.permute.xlu0 %2417 }
 0x414   :  { %vm2422_vm7 = vcmp.eq.s32.totalorder %v3529_v56, %v2418_v39  ;;  %v2433_v54 = vsel %vm2405_vm9, %v2669_v30, %v2399_v18 }
 0x415   :  { %v2668_v44 = vsel %vm2422_vm7, 1.0, %v3257_v28 }
 0x416   :  { %v2432_v58 = vsel %vm2404_vm8, %v2668_v44, %v2398_v14 }
 0x417   :  { %v2677_v59 = vpack.c.bf16 %v2433_v54, %v2432_v58 }
 0x419   :  { %2678 = vst [vmem:[#allocation7] sm:$0xff] %v2677_v59  }
 0x41a   :  { %3233 = shalt.err (!%p3230_p6)
}
 0x41b   :  { %s3234_s24 = scalar_lea.hbm %s3572_s4, 128 }
 0x41c   :  { %p3235_p7 = scmp.ne.s32.totalorder %s3572_s4, %s3234_s24  ;;  %p3238_p8 = scmp.lt.u32.totalorder %s3234_s24, %s3572_s4 }
 0x41e   :  { %p3240_p9 = pnand %p3238_p8, %p3235_p7 }
 0x420   :  { %3243 = shalt.err (!%p3240_p9)
}
 0x421   :  { %2455 = dma.vmem_to_hbm [thread:$0]  %s2450_s20, 128, %s3572_s4, [#allocation4], %s3254_s0, %s3254_s0, %s3255_s13  }
 0x422   :  { %3248 = dma.done.wait [#allocation4], 128  }
 0x423   :  { %3249 = vsyncadd [#allocation4], 4294967168 }
 0x424   :  { %2459 = vsyncpa [#allocation3], 1 }
 0x425   :  { %2460 = vsyncpa [#allocation6], 1 }
 0x426   :  { %2461 = vsyncpa [#allocation4], 1 }

</bundles_post_ra>
